<compile_context>
chip_gen: v6e
topology: v6e:2x2x1
jax: 0.10.0
libtpu: 0.0.40
codegen_flags: <defaults>
</compile_context>

<pallas_src>
import jax
import jax.numpy as jnp
from jax.experimental import pallas as pl
from jax.experimental.pallas import tpu as pltpu


def attn_kernel(x_ref, wqkv_ref, o_ref):
    # x_ref:    (B*S, D)  bf16  -- batch folded into rows for MXU occupancy
    # wqkv_ref: (D, 3D)   bf16  -- pre-transposed, fused [Wq^T | Wk^T | Wv^T]
    # o_ref:    (B, S, D) f32   -- lane-dense output (transpose done in wrapper)
    B, S, D = o_ref.shape

    # Single fused QKV projection: (B*S, D) @ (D, 3D) -> (B*S, 3D), f32 accum.
    qkv = jnp.dot(x_ref[...], wqkv_ref[...], preferred_element_type=jnp.float32)
    qkv = qkv.reshape(B, S, 3 * D)
    q = qkv[..., :D].astype(jnp.bfloat16)
    k = qkv[..., D:2 * D].astype(jnp.bfloat16)
    v = qkv[..., 2 * D:].astype(jnp.bfloat16)

    # scaled attention scores: (q @ k^T) * 5 per batch, f32 accumulation.
    s = jnp.einsum("bqd,bkd->bqk", q, k,
                   preferred_element_type=jnp.float32) * 5.0

    # numerically stable softmax over the last axis.
    s = s - jnp.max(s, axis=-1, keepdims=True)
    e = jnp.exp(s)
    p = e * pl.reciprocal(jnp.sum(e, axis=-1, keepdims=True), approx=True)

    # TODO(synk): nn.Dropout(0.1) is treated as inference-mode identity
    # (training-mode RNG dropout is not reproduced).

    out = jnp.einsum("bqk,bkd->bqd", p.astype(jnp.bfloat16), v,
                     preferred_element_type=jnp.float32)
    o_ref[...] = out.astype(o_ref.dtype)


def model_forward(x, w_key, w_query, w_value):
    B, S, D = x.shape
    assert D == 512, "feature dim must be 512 to match Linear(512, 512)"

    # nn.Linear computes x @ W^T: pre-transpose once here (wrapper-side, free)
    # and fuse the three projections into one (D, 3D) bf16 weight stream.
    wqkv = jnp.concatenate(
        [w_query.T, w_key.T, w_value.T], axis=1).astype(jnp.bfloat16)
    x2 = x.reshape(B * S, D).astype(jnp.bfloat16)

    out = pl.pallas_call(
        attn_kernel,
        out_shape=jax.ShapeDtypeStruct((B, S, D), jnp.float32),
        grid=(1,),
        in_specs=[
            pl.BlockSpec((B * S, D), lambda i: (0, 0)),      # folded x
            pl.BlockSpec((D, 3 * D), lambda i: (0, 0)),      # fused QKV weight
        ],
        out_specs=pl.BlockSpec((B, S, D), lambda i: (0, 0, 0)),
        compiler_params=pltpu.CompilerParams(
            dimension_semantics=("arbitrary",)),
    )(x2, wqkv)

    # final .transpose(-2, -1) applied outside the kernel so the kernel store
    # stays lane-dense (last dim = 512).
    return jnp.swapaxes(out, -2, -1)


def reference_forward(x, w_key, w_query, w_value):
    # pure-JAX reference using the same bf16-operand / f32-accumulation scheme
    # as the kernel, so the comparison is tight.
    xb = x.astype(jnp.bfloat16)
    key = jnp.einsum("bsd,ed->bse", xb, w_key.astype(jnp.bfloat16),
                     preferred_element_type=jnp.float32)
    query = jnp.einsum("bsd,ed->bse", xb, w_query.astype(jnp.bfloat16),
                       preferred_element_type=jnp.float32)
    value = jnp.einsum("bsd,ed->bse", xb, w_value.astype(jnp.bfloat16),
                       preferred_element_type=jnp.float32)
    qk = jnp.einsum("bqd,bkd->bqk", query.astype(jnp.bfloat16),
                    key.astype(jnp.bfloat16),
                    preferred_element_type=jnp.float32) * 5.0
    p = jax.nn.softmax(qk, axis=-1)
    out = jnp.einsum("bqk,bkd->bqd", p.astype(jnp.bfloat16),
                     value.astype(jnp.bfloat16),
                     preferred_element_type=jnp.float32)
    return jnp.swapaxes(out, -2, -1)


if __name__ == "__main__":
    B, S, D = 2, 8, 512
    root = jax.random.PRNGKey(0)
    kx, kk, kq, kv = jax.random.split(root, 4)

    # deterministic parameter init (like torch's default U(-1/sqrt(fan_in), .))
    bound = 1.0 / (D ** 0.5)
    w_key = jax.random.uniform(kk, (D, D), jnp.float32, -bound, bound)
    w_query = jax.random.uniform(kq, (D, D), jnp.float32, -bound, bound)
    w_value = jax.random.uniform(kv, (D, D), jnp.float32, -bound, bound)

    x = jax.random.normal(kx, (B, S, D), jnp.float32)

    out = jax.block_until_ready(model_forward(x, w_key, w_query, w_value))
    ref = reference_forward(x, w_key, w_query, w_value)

    assert out.shape == (B, D, S), out.shape
    # bf16 MXU operands + approx reciprocal => relaxed tolerance vs f32.
    assert jnp.allclose(out, ref, atol=1e-2, rtol=1e-2), \
        float(jnp.max(jnp.abs(out - ref)))

    print("KERNEL_OK")
</pallas_src>

<mosaic_0001>
module attributes {stable_mosaic.version = 11 : i64} {
  func.func @attn_kernel(%arg0: i32, %arg1: memref<16x512xbf16, #tpu.memory_space<vmem>>, %arg2: memref<512x1536xbf16, #tpu.memory_space<vmem>>, %arg3: memref<2x8x512xf32, #tpu.memory_space<vmem>>) attributes {dimension_semantics = [#tpu.dimension_semantics<arbitrary>], iteration_bounds = array<i64: 1>, scalar_prefetch = 0 : i64, scratch_operands = 0 : i64, tpu.core_type = #tpu.core_type<tc>, window_params = [{pipeline_mode = #tpu.pipeline_mode<synchronous>, transform_indices = @transform_0, window_bounds = array<i64: 16, 512>}, {pipeline_mode = #tpu.pipeline_mode<synchronous>, transform_indices = @transform_1, window_bounds = array<i64: 512, 1536>}, {pipeline_mode = #tpu.pipeline_mode<synchronous>, transform_indices = @transform_2, window_bounds = array<i64: 2, 8, 512>}]} {
    %c0 = arith.constant 0 : index
    %c0_0 = arith.constant 0 : index
    %0 = vector.load %arg1[%c0, %c0_0] : memref<16x512xbf16, #tpu.memory_space<vmem>>, vector<16x512xbf16>
    %c0_1 = arith.constant 0 : index
    %c0_2 = arith.constant 0 : index
    %1 = vector.load %arg2[%c0_1, %c0_2] : memref<512x1536xbf16, #tpu.memory_space<vmem>>, vector<512x1536xbf16>
    %cst = arith.constant dense<0.000000e+00> : vector<16x1536xf32>
    %2 = tpu.matmul %0, %1, %cst {dimension_numbers = #tpu.dot_dimension_numbers<[1], [0], [0], [1], [0, 0, 1, 1], [], []>} : vector<16x512xbf16>, vector<512x1536xbf16>, vector<16x1536xf32> -> vector<16x1536xf32>
    %3 = vector.shape_cast %2 : vector<16x1536xf32> to vector<2x8x1536xf32>
    %4 = vector.extract_strided_slice %3 {offsets = [0, 0, 0], sizes = [2, 8, 512], strides = [1, 1, 1]} : vector<2x8x1536xf32> to vector<2x8x512xf32>
    %5 = arith.truncf %4 : vector<2x8x512xf32> to vector<2x8x512xbf16>
    %6 = vector.extract_strided_slice %3 {offsets = [0, 0, 512], sizes = [2, 8, 512], strides = [1, 1, 1]} : vector<2x8x1536xf32> to vector<2x8x512xf32>
    %7 = arith.truncf %6 : vector<2x8x512xf32> to vector<2x8x512xbf16>
    %8 = vector.extract_strided_slice %3 {offsets = [0, 0, 1024], sizes = [2, 8, 512], strides = [1, 1, 1]} : vector<2x8x1536xf32> to vector<2x8x512xf32>
    %9 = arith.truncf %8 : vector<2x8x512xf32> to vector<2x8x512xbf16>
    "tpu.trace_start"() <{level = 10 : i32, message = "bqd,bkd->bqk"}> : () -> ()
    %cst_3 = arith.constant dense<0.000000e+00> : vector<2x8x8xf32>
    %10 = tpu.matmul %5, %7, %cst_3 {dimension_numbers = #tpu.dot_dimension_numbers<[2], [2], [1], [1], [0, 0, 0, 1, 1, 1], [0], [0]>} : vector<2x8x512xbf16>, vector<2x8x512xbf16>, vector<2x8x8xf32> -> vector<2x8x8xf32>
    "tpu.trace_stop"() : () -> ()
    %cst_4 = arith.constant 5.000000e+00 : f32
    %11 = vector.broadcast %cst_4 : f32 to vector<2x8x8xf32>
    %12 = arith.mulf %10, %11 : vector<2x8x8xf32>
    %cst_5 = arith.constant dense<0xFF800000> : vector<2x8xf32>
    %13 = vector.multi_reduction <maximumf>, %12, %cst_5 [2] : vector<2x8x8xf32> to vector<2x8xf32>
    %14 = vector.shape_cast %13 : vector<2x8xf32> to vector<2x8x1xf32>
    %15 = vector.broadcast %14 : vector<2x8x1xf32> to vector<2x8x8xf32>
    %16 = arith.subf %12, %15 : vector<2x8x8xf32>
    %17 = math.exp %16 : vector<2x8x8xf32>
    %cst_6 = arith.constant dense<0.000000e+00> : vector<2x8xf32>
    %18 = vector.multi_reduction <add>, %17, %cst_6 [2] : vector<2x8x8xf32> to vector<2x8xf32>
    %19 = vector.shape_cast %18 : vector<2x8xf32> to vector<2x8x1xf32>
    %20 = tpu.reciprocal %19 {approx = true} : vector<2x8x1xf32> -> vector<2x8x1xf32>
    %21 = vector.broadcast %20 : vector<2x8x1xf32> to vector<2x8x8xf32>
    %22 = arith.mulf %17, %21 : vector<2x8x8xf32>
    %23 = arith.truncf %22 : vector<2x8x8xf32> to vector<2x8x8xbf16>
    "tpu.trace_start"() <{level = 10 : i32, message = "bqk,bkd->bqd"}> : () -> ()
    %cst_7 = arith.constant dense<0.000000e+00> : vector<2x8x512xf32>
    %24 = tpu.matmul %23, %9, %cst_7 {dimension_numbers = #tpu.dot_dimension_numbers<[2], [1], [1], [2], [0, 0, 0, 1, 1, 2], [0], [0]>} : vector<2x8x8xbf16>, vector<2x8x512xbf16>, vector<2x8x512xf32> -> vector<2x8x512xf32>
    "tpu.trace_stop"() : () -> ()
    %c0_8 = arith.constant 0 : index
    %c0_9 = arith.constant 0 : index
    %c0_10 = arith.constant 0 : index
    %25 = vector.load %arg3[%c0_8, %c0_9, %c0_10] : memref<2x8x512xf32, #tpu.memory_space<vmem>>, vector<2x8x512xf32>
    tpu.vector_store %arg3[%c0_8, %c0_9, %c0_10], %24 {strides = array<i32>} : memref<2x8x512xf32, #tpu.memory_space<vmem>>, vector<2x8x512xf32>,
    return
  }
  func.func @transform_0(%arg0: i32) -> (i32, i32) {
    %c0_i32 = arith.constant 0 : i32
    %c0_i32_0 = arith.constant 0 : i32
    %c0_i32_1 = arith.constant 0 : i32
    return %c0_i32, %c0_i32_0 : i32, i32
  }
  func.func @transform_1(%arg0: i32) -> (i32, i32) {
    %c0_i32 = arith.constant 0 : i32
    %c0_i32_0 = arith.constant 0 : i32
    %c0_i32_1 = arith.constant 0 : i32
    return %c0_i32, %c0_i32_0 : i32, i32
  }
  func.func @transform_2(%arg0: i32) -> (i32, i32, i32) {
    %c0_i32 = arith.constant 0 : i32
    %c0_i32_0 = arith.constant 0 : i32
    %c0_i32_1 = arith.constant 0 : i32
    %c0_i32_2 = arith.constant 0 : i32
    return %c0_i32, %c0_i32_0, %c0_i32_1 : i32, i32, i32
  }
}

</mosaic_0001>

<bundles_post_ra>
// kernel: tpu_custom_call.1
= control target key start
LH: loop header
LB: loop body
LE: loop exit
PB: predicated region body
PF: predicated region fallthrough
CT: control target
= control target key end

     0   :  { %7 = vsyncpa [#allocation3], 0  ;;  %s4519_s0 = inlined_call_operand.hbm [shape: bf16[16,512], index: 0, kind: input, shape index: {}]   ;;  %s4520_s1 = inlined_call_operand.hbm [shape: bf16[512,1536], index: 1, kind: input, shape index: {}]   ;;  %s4521_s2 = inlined_call_operand.hbm [shape: f32[2,8,512], index: 2, kind: output, shape index: {}]  }
   0x1   :  { %8 = vsyncpa [#allocation6], 0 }
   0x2   :  { %9 = vsyncpa [#allocation4], 0  ;;  %s4383_s9 = smov [#allocation2]  }
   0x3   :  { %s15_s10 = sshll.u32 %s4383_s9, 4  ;;  %s16_s10 = int_to_ptr.vmem [resolvable:$true] %s15_s10 }
   0x4   :  { %s4325_s11 = scalar_lea.vmem %s16_s10, 512  ;;  %p4330_p1 = scmp.lt.s32.totalorder %s16_s10, %s16_s10 }
   0x5   :  { %p4326_p0 = scmp.ne.s32.totalorder %s16_s10, %s4325_s11  ;;  %p4331_p2 = scmp.lt.s32.totalorder %s4325_s11, %s4325_s11 }
   0x7   :  { %p4332_p3 = por %p4331_p2, %p4330_p1 }
   0x9   :  { %p4333_p4 = pnand %p4332_p3, %p4326_p0 }
   0xb   :  { %4336 = shalt.err (!%p4333_p4)
}
   0xc   :  { %s4384_s12 = smov 256   ;;  %s4385_s13 = smov 16  }
   0xd   :  { %21 = dma.hbm_to_vmem [thread:$0]  %s4519_s0, 512, %s16_s10, [#allocation3], %s4384_s12, %s4384_s12, %s4385_s13  }
   0xe   :  { %s4386_s16 = smov [#allocation5]  }
   0xf   :  { %s27_s17 = sshll.u32 %s4386_s16, 4  ;;  %s28_s17 = int_to_ptr.vmem [resolvable:$true] %s27_s17 }
  0x10   :  { %s4345_s18 = scalar_lea.vmem %s28_s17, 49152  ;;  %p4350_p6 = scmp.lt.s32.totalorder %s28_s17, %s28_s17 }
  0x11   :  { %p4346_p5 = scmp.ne.s32.totalorder %s28_s17, %s4345_s18  ;;  %p4351_p7 = scmp.lt.s32.totalorder %s4345_s18, %s4345_s18 }
  0x13   :  { %p4352_p8 = por %p4351_p7, %p4350_p6 }
  0x15   :  { %p4353_p9 = pnand %p4352_p8, %p4346_p5 }
  0x17   :  { %4356 = shalt.err (!%p4353_p9)
}
  0x18   :  { %s4387_s19 = smov 768   ;;  %s4388_s20 = smov 48  }
  0x19   :  { %33 = dma.hbm_to_vmem [thread:$0]  %s4520_s1, 49152, %s28_s17, [#allocation6], %s4387_s19, %s4387_s19, %s4388_s20  }
  0x1a   :  { %4377 = dma.done.wait [#allocation3], 512  }
  0x1b   :  { %4378 = vsyncadd [#allocation3], 4294966784 }
  0x1c   :  { %4379 = dma.done.wait [#allocation6], 49152  }
  0x1d   :  { %4380 = vsyncadd [#allocation6], 4294918144  ;;  %v3723_v0 = vld [vmem:[#allocation5 + $0x2a4] ss:$48 sps:$4 sm:$0xff]   ;;  %v3727_v2 = vld [vmem:[#allocation5 + $0x2a0] ss:$48 sps:$4 sm:$0xff]  }
  0x1e   :  { %v3725_v1 = vld [vmem:[#allocation5 + $0x8a4] ss:$48 sps:$4 sm:$0xff]   ;;  %2369 = vmatprep.subr.bf16.mxu0 %v3723_v0  ;;  %v3728_v3 = vld [vmem:[#allocation5 + $0x8a0] ss:$48 sps:$4 sm:$0xff]   ;;  %v4416_v50 = vld [vmem:[#allocation2 + $0xc] ss:$16 sps:$4 sm:$0xff]  }
  0x1f   :  { %2412 = vmatprep.subr.bf16.mxu1 %v3725_v1  ;;  %v3729_v4 = vld [vmem:[#allocation5 + $0x244] ss:$48 sps:$4 sm:$0xff]   ;;  %2370 = vmatpush1.bf16.msra.mxu0 %v3727_v2  ;;  %v3733_v6 = vld [vmem:[#allocation5 + $0x240] ss:$48 sps:$4 sm:$0xff]   ;;  %v3827_v2 = vld [vmem:[#allocation5 + $0x2ac] ss:$48 sps:$4 sm:$0xff]  }
  0x20   :  { %2413 = vmatpush1.bf16.msra.mxu1 %v3728_v3  ;;  %v3731_v5 = vld [vmem:[#allocation5 + $0x844] ss:$48 sps:$4 sm:$0xff]   ;;  %2371 = vmatprep.subr.bf16.mxu0 %v3729_v4  ;;  %v3734_v7 = vld [vmem:[#allocation5 + $0x840] ss:$48 sps:$4 sm:$0xff]   ;;  %v3830_v3 = vld [vmem:[#allocation5 + $0x8ac] ss:$48 sps:$4 sm:$0xff]  }
  0x21   :  { %2414 = vmatprep.subr.bf16.mxu1 %v3731_v5  ;;  %v3735_v8 = vld [vmem:[#allocation5 + $0x1e4] ss:$48 sps:$4 sm:$0xff]   ;;  %v3739_v10 = vld [vmem:[#allocation5 + $0x1e0] ss:$48 sps:$4 sm:$0xff]   ;;  %2444 = vmatprep.mubr.bf16.mxu1 %v4416_v50  ;;  %v4422_v5 = vld [vmem:[#allocation2 + $0x8] ss:$16 sps:$4 sm:$0xff]  }
  0x22   :  { %v3737_v9 = vld [vmem:[#allocation5 + $0x7e4] ss:$48 sps:$4 sm:$0xff]   ;;  %v3740_v11 = vld [vmem:[#allocation5 + $0x7e0] ss:$48 sps:$4 sm:$0xff]   ;;  %vm3099_vm0 = vcmask 1043456   ;;  %vm3071_vm1 = vcmask 64512  }
  0x23   :  { %2372 = vmatpush1.bf16.msra.mxu0 %v3733_v6  ;;  %v3741_v12 = vld [vmem:[#allocation5 + $0x184] ss:$48 sps:$4 sm:$0xff]   ;;  %v3745_v14 = vld [vmem:[#allocation5 + $0x180] ss:$48 sps:$4 sm:$0xff]   ;;  %v3825_v6 = vld [vmem:[#allocation5 + $0x2a8] ss:$48 sps:$4 sm:$0xff]  }
  0x24   :  { %2415 = vmatpush1.bf16.msra.mxu1 %v3734_v7  ;;  %2373 = vmatprep.subr.bf16.mxu0 %v3735_v8  ;;  %v3743_v13 = vld [vmem:[#allocation5 + $0x784] ss:$48 sps:$4 sm:$0xff]   ;;  %v3746_v15 = vld [vmem:[#allocation5 + $0x780] ss:$48 sps:$4 sm:$0xff]   ;;  %v3828_v7 = vld [vmem:[#allocation5 + $0x8a8] ss:$48 sps:$4 sm:$0xff]  }
  0x25   :  { %2416 = vmatprep.subr.bf16.mxu1 %v3737_v9  ;;  %v3747_v16 = vld [vmem:[#allocation5 + $0x124] ss:$48 sps:$4 sm:$0xff]   ;;  %v3751_v18 = vld [vmem:[#allocation5 + $0x120] ss:$48 sps:$4 sm:$0xff]   ;;  %v3833_v8 = vld [vmem:[#allocation5 + $0x24c] ss:$48 sps:$4 sm:$0xff]  }
  0x26   :  { %v3749_v17 = vld [vmem:[#allocation5 + $0x724] ss:$48 sps:$4 sm:$0xff]   ;;  %v3752_v19 = vld [vmem:[#allocation5 + $0x720] ss:$48 sps:$4 sm:$0xff]   ;;  %v3836_v9 = vld [vmem:[#allocation5 + $0x84c] ss:$48 sps:$4 sm:$0xff]  }
  0x27   :  { %2374 = vmatpush1.bf16.msra.mxu0 %v3739_v10  ;;  %v3753_v20 = vld [vmem:[#allocation5 + $0xc4] ss:$48 sps:$4 sm:$0xff]   ;;  %v3757_v22 = vld [vmem:[#allocation5 + $0xc0] ss:$48 sps:$4 sm:$0xff]   ;;  %v3831_v10 = vld [vmem:[#allocation5 + $0x248] ss:$48 sps:$4 sm:$0xff]  }
  0x28   :  { %2417 = vmatpush1.bf16.msra.mxu1 %v3740_v11  ;;  %2375 = vmatprep.subr.bf16.mxu0 %v3741_v12  ;;  %v3755_v21 = vld [vmem:[#allocation5 + $0x6c4] ss:$48 sps:$4 sm:$0xff]   ;;  %v3758_v23 = vld [vmem:[#allocation5 + $0x6c0] ss:$48 sps:$4 sm:$0xff]   ;;  %v3834_v11 = vld [vmem:[#allocation5 + $0x848] ss:$48 sps:$4 sm:$0xff]  }
  0x29   :  { %2418 = vmatprep.subr.bf16.mxu1 %v3743_v13  ;;  %v3759_v24 = vld [vmem:[#allocation5 + $0x64] ss:$48 sps:$4 sm:$0xff]   ;;  %v3763_v26 = vld [vmem:[#allocation5 + $0x60] ss:$48 sps:$4 sm:$0xff]   ;;  %v3839_v12 = vld [vmem:[#allocation5 + $0x1ec] ss:$48 sps:$4 sm:$0xff]  }
  0x2a   :  { %v3761_v25 = vld [vmem:[#allocation5 + $0x664] ss:$48 sps:$4 sm:$0xff]   ;;  %v3764_v27 = vld [vmem:[#allocation5 + $0x660] ss:$48 sps:$4 sm:$0xff]   ;;  %v3842_v13 = vld [vmem:[#allocation5 + $0x7ec] ss:$48 sps:$4 sm:$0xff]  }
  0x2b   :  { %2376 = vmatpush1.bf16.msra.mxu0 %v3745_v14  ;;  %v3765_v28 = vld [vmem:[#allocation5 + $0x4] ss:$48 sps:$4 sm:$0xff]   ;;  %v3769_v30 = vld [vmem:[#allocation5] ss:$48 sps:$4 sm:$0xff]   ;;  %v3837_v14 = vld [vmem:[#allocation5 + $0x1e8] ss:$48 sps:$4 sm:$0xff]  }
  0x2c   :  { %2419 = vmatpush1.bf16.msra.mxu1 %v3746_v15  ;;  %2377 = vmatprep.subr.bf16.mxu0 %v3747_v16  ;;  %v3767_v29 = vld [vmem:[#allocation5 + $0x604] ss:$48 sps:$4 sm:$0xff]   ;;  %v3770_v31 = vld [vmem:[#allocation5 + $0x600] ss:$48 sps:$4 sm:$0xff]   ;;  %v3840_v15 = vld [vmem:[#allocation5 + $0x7e8] ss:$48 sps:$4 sm:$0xff]  }
  0x2d   :  { %2420 = vmatprep.subr.bf16.mxu1 %v3749_v17  ;;  %v3771_v32 = vld [vmem:[#allocation5 + $0x5a4] ss:$48 sps:$4 sm:$0xff]   ;;  %v3775_v34 = vld [vmem:[#allocation5 + $0x5a0] ss:$48 sps:$4 sm:$0xff]   ;;  %v3845_v16 = vld [vmem:[#allocation5 + $0x18c] ss:$48 sps:$4 sm:$0xff]  }
  0x2e   :  { %v3773_v33 = vld [vmem:[#allocation5 + $0xba4] ss:$48 sps:$4 sm:$0xff]   ;;  %v3776_v35 = vld [vmem:[#allocation5 + $0xba0] ss:$48 sps:$4 sm:$0xff]   ;;  %v3848_v17 = vld [vmem:[#allocation5 + $0x78c] ss:$48 sps:$4 sm:$0xff]  }
  0x2f   :  { %2378 = vmatpush1.bf16.msra.mxu0 %v3751_v18  ;;  %v3777_v36 = vld [vmem:[#allocation5 + $0x544] ss:$48 sps:$4 sm:$0xff]   ;;  %v3781_v38 = vld [vmem:[#allocation5 + $0x540] ss:$48 sps:$4 sm:$0xff]   ;;  %v3843_v18 = vld [vmem:[#allocation5 + $0x188] ss:$48 sps:$4 sm:$0xff]  }
  0x30   :  { %2421 = vmatpush1.bf16.msra.mxu1 %v3752_v19  ;;  %2379 = vmatprep.subr.bf16.mxu0 %v3753_v20  ;;  %v3779_v37 = vld [vmem:[#allocation5 + $0xb44] ss:$48 sps:$4 sm:$0xff]   ;;  %v3782_v39 = vld [vmem:[#allocation5 + $0xb40] ss:$48 sps:$4 sm:$0xff]   ;;  %v3846_v19 = vld [vmem:[#allocation5 + $0x788] ss:$48 sps:$4 sm:$0xff]  }
  0x31   :  { %2422 = vmatprep.subr.bf16.mxu1 %v3755_v21  ;;  %v3783_v40 = vld [vmem:[#allocation5 + $0x4e4] ss:$48 sps:$4 sm:$0xff]   ;;  %v3787_v42 = vld [vmem:[#allocation5 + $0x4e0] ss:$48 sps:$4 sm:$0xff]   ;;  %v3851_v20 = vld [vmem:[#allocation5 + $0x12c] ss:$48 sps:$4 sm:$0xff]  }
  0x32   :  { %v3785_v41 = vld [vmem:[#allocation5 + $0xae4] ss:$48 sps:$4 sm:$0xff]   ;;  %v3788_v43 = vld [vmem:[#allocation5 + $0xae0] ss:$48 sps:$4 sm:$0xff]   ;;  %v3854_v21 = vld [vmem:[#allocation5 + $0x72c] ss:$48 sps:$4 sm:$0xff]  }
  0x33   :  { %2380 = vmatpush1.bf16.msra.mxu0 %v3757_v22  ;;  %v3789_v44 = vld [vmem:[#allocation5 + $0x484] ss:$48 sps:$4 sm:$0xff]   ;;  %v3793_v46 = vld [vmem:[#allocation5 + $0x480] ss:$48 sps:$4 sm:$0xff]   ;;  %v3849_v22 = vld [vmem:[#allocation5 + $0x128] ss:$48 sps:$4 sm:$0xff]  }
  0x34   :  { %2423 = vmatpush1.bf16.msra.mxu1 %v3758_v23  ;;  %2381 = vmatprep.subr.bf16.mxu0 %v3759_v24  ;;  %v3791_v45 = vld [vmem:[#allocation5 + $0xa84] ss:$48 sps:$4 sm:$0xff]   ;;  %v3794_v47 = vld [vmem:[#allocation5 + $0xa80] ss:$48 sps:$4 sm:$0xff]   ;;  %v3852_v23 = vld [vmem:[#allocation5 + $0x728] ss:$48 sps:$4 sm:$0xff]  }
  0x35   :  { %2424 = vmatprep.subr.bf16.mxu1 %v3761_v25  ;;  %v4414_v48 = vld [vmem:[#allocation2 + $0x4] ss:$16 sps:$4 sm:$0xff]   ;;  %v3799_v52 = vld [vmem:[#allocation5 + $0x420] ss:$48 sps:$4 sm:$0xff]   ;;  %v3857_v24 = vld [vmem:[#allocation5 + $0xcc] ss:$48 sps:$4 sm:$0xff]  }
  0x36   :  { %v3795_v49 = vld [vmem:[#allocation5 + $0x424] ss:$48 sps:$4 sm:$0xff]   ;;  %2401 = vmatprep.mubr.bf16.mxu0 %v4414_v48  ;;  %v3800_v53 = vld [vmem:[#allocation5 + $0xa20] ss:$48 sps:$4 sm:$0xff]   ;;  %v3860_v25 = vld [vmem:[#allocation5 + $0x6cc] ss:$48 sps:$4 sm:$0xff]  }
  0x37   :  { %2382 = vmatpush1.bf16.msra.mxu0 %v3763_v26  ;;  %v3797_v51 = vld [vmem:[#allocation5 + $0xa24] ss:$48 sps:$4 sm:$0xff]   ;;  %v3805_v56 = vld [vmem:[#allocation5 + $0x3c0] ss:$48 sps:$4 sm:$0xff]   ;;  %v3855_v26 = vld [vmem:[#allocation5 + $0xc8] ss:$48 sps:$4 sm:$0xff]  }
  0x38   :  { %2425 = vmatpush1.bf16.msra.mxu1 %v3764_v27  ;;  %2383 = vmatprep.subr.bf16.mxu0 %v3765_v28  ;;  %v3801_v54 = vld [vmem:[#allocation5 + $0x3c4] ss:$48 sps:$4 sm:$0xff]   ;;  %v3806_v57 = vld [vmem:[#allocation5 + $0x9c0] ss:$48 sps:$4 sm:$0xff]   ;;  %v3858_v27 = vld [vmem:[#allocation5 + $0x6c8] ss:$48 sps:$4 sm:$0xff]  }
  0x39   :  { %2426 = vmatprep.subr.bf16.mxu1 %v3767_v29  ;;  %v3803_v55 = vld [vmem:[#allocation5 + $0x9c4] ss:$48 sps:$4 sm:$0xff]   ;;  %v3811_v60 = vld [vmem:[#allocation5 + $0x360] ss:$48 sps:$4 sm:$0xff]   ;;  %v3863_v28 = vld [vmem:[#allocation5 + $0x6c] ss:$48 sps:$4 sm:$0xff]  }
  0x3a   :  { %v3807_v58 = vld [vmem:[#allocation5 + $0x364] ss:$48 sps:$4 sm:$0xff]   ;;  %v3812_v61 = vld [vmem:[#allocation5 + $0x960] ss:$48 sps:$4 sm:$0xff]   ;;  %v3866_v29 = vld [vmem:[#allocation5 + $0x66c] ss:$48 sps:$4 sm:$0xff]  }
  0x3b   :  { %2384 = vmatpush1.bf16.msra.mxu0 %v3769_v30  ;;  %v3809_v59 = vld [vmem:[#allocation5 + $0x964] ss:$48 sps:$4 sm:$0xff]   ;;  %v3817_v0 = vld [vmem:[#allocation5 + $0x300] ss:$48 sps:$4 sm:$0xff]   ;;  %v3861_v30 = vld [vmem:[#allocation5 + $0x68] ss:$48 sps:$4 sm:$0xff]  }
  0x3c   :  { %2427 = vmatpush1.bf16.msra.mxu1 %v3770_v31  ;;  %2385 = vmatprep.subr.bf16.mxu0 %v3771_v32  ;;  %v3813_v62 = vld [vmem:[#allocation5 + $0x304] ss:$48 sps:$4 sm:$0xff]   ;;  %v3818_v1 = vld [vmem:[#allocation5 + $0x900] ss:$48 sps:$4 sm:$0xff]   ;;  %v3864_v31 = vld [vmem:[#allocation5 + $0x668] ss:$48 sps:$4 sm:$0xff]  }
  0x3d   :  { %2428 = vmatprep.subr.bf16.mxu1 %v3773_v33  ;;  %v3815_v63 = vld [vmem:[#allocation5 + $0x904] ss:$48 sps:$4 sm:$0xff]   ;;  %v4420_v4 = vld [vmem:[#allocation2] ss:$16 sps:$4 sm:$0xff]   ;;  %v3869_v32 = vld [vmem:[#allocation5 + $0xc] ss:$48 sps:$4 sm:$0xff]  }
  0x3e   :  { %v3872_v33 = vld [vmem:[#allocation5 + $0x60c] ss:$48 sps:$4 sm:$0xff]   ;;  %s4390_s0 = smov [#allocation7]  }
  0x3f   :  { %2386 = vmatpush2.bf16.msra.mxu0 %v3775_v34  ;;  %v3867_v34 = vld [vmem:[#allocation5 + $0x8] ss:$48 sps:$4 sm:$0xff]   ;;  %s3304_s1 = sshll.u32 %s4390_s0, 4  ;;  %s3305_s1 = int_to_ptr.vmem [resolvable:$true] %s3304_s1 }
  0x40   :  { %2429 = vmatpush2.bf16.msra.mxu1 %v3776_v35  ;;  %2387 = vmatprep.subr.bf16.mxu0 %v3777_v36  ;;  %v3870_v35 = vld [vmem:[#allocation5 + $0x608] ss:$48 sps:$4 sm:$0xff]   ;;  %v3875_v36 = vld [vmem:[#allocation5 + $0x5ac] ss:$48 sps:$4 sm:$0xff]   ;;  %s4357_s23 = scalar_lea.vmem %s3305_s1, 1024  ;;  %p4362_p11 = scmp.lt.s32.totalorder %s3305_s1, %s3305_s1 }
  0x41   :  { %2430 = vmatprep.subr.bf16.mxu1 %v3779_v37  ;;  %v3878_v37 = vld [vmem:[#allocation5 + $0xbac] ss:$48 sps:$4 sm:$0xff]   ;;  %p4358_p10 = scmp.ne.s32.totalorder %s3305_s1, %s4357_s23  ;;  %p4363_p12 = scmp.lt.s32.totalorder %s4357_s23, %s4357_s23 }
  0x43   :  { %2388 = vmatpush2.bf16.msra.mxu0 %v3781_v38  ;;  %v3873_v38 = vld [vmem:[#allocation5 + $0x5a8] ss:$48 sps:$4 sm:$0xff]   ;;  %p4364_p13 = por %p4363_p12, %p4362_p11 }
  0x44   :  { %2431 = vmatpush2.bf16.msra.mxu1 %v3782_v39  ;;  %2389 = vmatprep.subr.bf16.mxu0 %v3783_v40  ;;  %v3876_v39 = vld [vmem:[#allocation5 + $0xba8] ss:$48 sps:$4 sm:$0xff]   ;;  %v3881_v40 = vld [vmem:[#allocation5 + $0x54c] ss:$48 sps:$4 sm:$0xff]  }
  0x45   :  { %2432 = vmatprep.subr.bf16.mxu1 %v3785_v41  ;;  %v3884_v41 = vld [vmem:[#allocation5 + $0xb4c] ss:$48 sps:$4 sm:$0xff]   ;;  %p4365_p0 = pnand %p4364_p13, %p4358_p10 }
  0x47   :  { %2390 = vmatpush2.bf16.msra.mxu0 %v3787_v42  ;;  %v3879_v42 = vld [vmem:[#allocation5 + $0x548] ss:$48 sps:$4 sm:$0xff]  }
  0x48   :  { %2433 = vmatpush2.bf16.msra.mxu1 %v3788_v43  ;;  %2391 = vmatprep.subr.bf16.mxu0 %v3789_v44  ;;  %v3882_v43 = vld [vmem:[#allocation5 + $0xb48] ss:$48 sps:$4 sm:$0xff]   ;;  %v3887_v44 = vld [vmem:[#allocation5 + $0x4ec] ss:$48 sps:$4 sm:$0xff]  }
  0x49   :  { %2434 = vmatprep.subr.bf16.mxu1 %v3791_v45  ;;  %v3890_v45 = vld [vmem:[#allocation5 + $0xaec] ss:$48 sps:$4 sm:$0xff]  }
  0x4b   :  { %2392 = vmatpush2.bf16.msra.mxu0 %v3793_v46  ;;  %v3885_v46 = vld [vmem:[#allocation5 + $0x4e8] ss:$48 sps:$4 sm:$0xff]  }
  0x4c   :  { %2435 = vmatpush2.bf16.msra.mxu1 %v3794_v47  ;;  %2393 = vmatprep.subr.bf16.mxu0 %v3795_v49  ;;  %v3888_v47 = vld [vmem:[#allocation5 + $0xae8] ss:$48 sps:$4 sm:$0xff]   ;;  %v3893_v49 = vld [vmem:[#allocation5 + $0x48c] ss:$48 sps:$4 sm:$0xff]  }
  0x4d   :  { %2436 = vmatprep.subr.bf16.mxu1 %v3797_v51  ;;  %v3896_v51 = vld [vmem:[#allocation5 + $0xa8c] ss:$48 sps:$4 sm:$0xff]  }
  0x4f   :  { %2394 = vmatpush2.bf16.msra.mxu0 %v3799_v52  ;;  %v3891_v52 = vld [vmem:[#allocation5 + $0x488] ss:$48 sps:$4 sm:$0xff]  }
  0x50   :  { %2437 = vmatpush2.bf16.msra.mxu1 %v3800_v53  ;;  %2395 = vmatprep.subr.bf16.mxu0 %v3801_v54  ;;  %v3894_v53 = vld [vmem:[#allocation5 + $0xa88] ss:$48 sps:$4 sm:$0xff]   ;;  %v3899_v54 = vld [vmem:[#allocation5 + $0x42c] ss:$48 sps:$4 sm:$0xff]  }
  0x51   :  { %2438 = vmatprep.subr.bf16.mxu1 %v3803_v55  ;;  %v3902_v55 = vld [vmem:[#allocation5 + $0xa2c] ss:$48 sps:$4 sm:$0xff]  }
  0x53   :  { %2396 = vmatpush2.bf16.msra.mxu0 %v3805_v56  ;;  %v3897_v56 = vld [vmem:[#allocation5 + $0x428] ss:$48 sps:$4 sm:$0xff]  }
  0x54   :  { %2439 = vmatpush2.bf16.msra.mxu1 %v3806_v57  ;;  %2397 = vmatprep.subr.bf16.mxu0 %v3807_v58  ;;  %v3900_v57 = vld [vmem:[#allocation5 + $0xa28] ss:$48 sps:$4 sm:$0xff]   ;;  %v3905_v58 = vld [vmem:[#allocation5 + $0x3cc] ss:$48 sps:$4 sm:$0xff]  }
  0x55   :  { %2440 = vmatprep.subr.bf16.mxu1 %v3809_v59  ;;  %v3908_v59 = vld [vmem:[#allocation5 + $0x9cc] ss:$48 sps:$4 sm:$0xff]  }
  0x57   :  { %2398 = vmatpush2.bf16.msra.mxu0 %v3811_v60  ;;  %v3903_v60 = vld [vmem:[#allocation5 + $0x3c8] ss:$48 sps:$4 sm:$0xff]  }
  0x58   :  { %2441 = vmatpush2.bf16.msra.mxu1 %v3812_v61  ;;  %2399 = vmatprep.subr.bf16.mxu0 %v3813_v62  ;;  %v3906_v61 = vld [vmem:[#allocation5 + $0x9c8] ss:$48 sps:$4 sm:$0xff]   ;;  %v3911_v62 = vld [vmem:[#allocation5 + $0x36c] ss:$48 sps:$4 sm:$0xff]  }
  0x59   :  { %2442 = vmatprep.subr.bf16.mxu1 %v3815_v63  ;;  %v3914_v63 = vld [vmem:[#allocation5 + $0x96c] ss:$48 sps:$4 sm:$0xff]  }
  0x5b   :  { %2400 = vmatpush2.bf16.msra.mxu0 %v3817_v0  ;;  %v3909_v0 = vld [vmem:[#allocation5 + $0x368] ss:$48 sps:$4 sm:$0xff]  }
  0x5c   :  { %2443 = vmatpush2.bf16.msra.mxu1 %v3818_v1  ;;  %2455 = vmatprep.subr.bf16.mxu0 %v3827_v2  ;;  %v3912_v1 = vld [vmem:[#allocation5 + $0x968] ss:$48 sps:$4 sm:$0xff]   ;;  %v3917_v2 = vld [vmem:[#allocation5 + $0x30c] ss:$48 sps:$4 sm:$0xff]  }
  0x5d   :  { %2498 = vmatprep.subr.bf16.mxu1 %v3830_v3  ;;  %v3920_v3 = vld [vmem:[#allocation5 + $0x90c] ss:$48 sps:$4 sm:$0xff]  }
  0x5e   :  { %2402 = vmatmul.mubr.bf16.vlgmr.msra.gmra.mxu0 %v4420_v4 }
  0x5f   :  { %2445 = vmatmul.mubr.bf16.vlgmr.msra.gmra.mxu1 %v4422_v5  ;;  %2456 = vmatpush1.bf16.msra.mxu0 %v3825_v6  ;;  %v3915_v6 = vld [vmem:[#allocation5 + $0x308] ss:$48 sps:$4 sm:$0xff]  }
  0x60   :  { %2499 = vmatpush1.bf16.msra.mxu1 %v3828_v7  ;;  %2457 = vmatprep.subr.bf16.mxu0 %v3833_v8  ;;  %v3918_v7 = vld [vmem:[#allocation5 + $0x908] ss:$48 sps:$4 sm:$0xff]   ;;  %v3923_v8 = vld [vmem:[#allocation5 + $0x2b4] ss:$48 sps:$4 sm:$0xff]  }
  0x61   :  { %2500 = vmatprep.subr.bf16.mxu1 %v3836_v9  ;;  %2487 = vmatprep.mubr.bf16.mxu0 %v4414_v48  ;;  %v3926_v9 = vld [vmem:[#allocation5 + $0x8b4] ss:$48 sps:$4 sm:$0xff]  }
  0x62   :  { %2530 = vmatprep.mubr.bf16.mxu1 %v4416_v50 }
  0x63   :  { %2458 = vmatpush1.bf16.msra.mxu0 %v3831_v10  ;;  %v3921_v10 = vld [vmem:[#allocation5 + $0x2b0] ss:$48 sps:$4 sm:$0xff]  }
  0x64   :  { %2501 = vmatpush1.bf16.msra.mxu1 %v3834_v11  ;;  %2459 = vmatprep.subr.bf16.mxu0 %v3839_v12  ;;  %v3924_v11 = vld [vmem:[#allocation5 + $0x8b0] ss:$48 sps:$4 sm:$0xff]   ;;  %v3929_v12 = vld [vmem:[#allocation5 + $0x254] ss:$48 sps:$4 sm:$0xff]  }
  0x65   :  { %2502 = vmatprep.subr.bf16.mxu1 %v3842_v13  ;;  %v3932_v13 = vld [vmem:[#allocation5 + $0x854] ss:$48 sps:$4 sm:$0xff]  }
  0x67   :  { %2460 = vmatpush1.bf16.msra.mxu0 %v3837_v14  ;;  %v3927_v14 = vld [vmem:[#allocation5 + $0x250] ss:$48 sps:$4 sm:$0xff]  }
  0x68   :  { %2503 = vmatpush1.bf16.msra.mxu1 %v3840_v15  ;;  %2461 = vmatprep.subr.bf16.mxu0 %v3845_v16  ;;  %v3930_v15 = vld [vmem:[#allocation5 + $0x850] ss:$48 sps:$4 sm:$0xff]   ;;  %v3935_v16 = vld [vmem:[#allocation5 + $0x1f4] ss:$48 sps:$4 sm:$0xff]  }
  0x69   :  { %2504 = vmatprep.subr.bf16.mxu1 %v3848_v17  ;;  %v3938_v17 = vld [vmem:[#allocation5 + $0x7f4] ss:$48 sps:$4 sm:$0xff]  }
  0x6b   :  { %2462 = vmatpush1.bf16.msra.mxu0 %v3843_v18  ;;  %v3933_v18 = vld [vmem:[#allocation5 + $0x1f0] ss:$48 sps:$4 sm:$0xff]  }
  0x6c   :  { %2505 = vmatpush1.bf16.msra.mxu1 %v3846_v19  ;;  %2463 = vmatprep.subr.bf16.mxu0 %v3851_v20  ;;  %v3936_v19 = vld [vmem:[#allocation5 + $0x7f0] ss:$48 sps:$4 sm:$0xff]   ;;  %v3941_v20 = vld [vmem:[#allocation5 + $0x194] ss:$48 sps:$4 sm:$0xff]  }
  0x6d   :  { %2506 = vmatprep.subr.bf16.mxu1 %v3854_v21  ;;  %v3944_v21 = vld [vmem:[#allocation5 + $0x794] ss:$48 sps:$4 sm:$0xff]  }
  0x6f   :  { %2464 = vmatpush1.bf16.msra.mxu0 %v3849_v22  ;;  %v3939_v22 = vld [vmem:[#allocation5 + $0x190] ss:$48 sps:$4 sm:$0xff]  }
  0x70   :  { %2507 = vmatpush1.bf16.msra.mxu1 %v3852_v23  ;;  %2465 = vmatprep.subr.bf16.mxu0 %v3857_v24  ;;  %v3942_v23 = vld [vmem:[#allocation5 + $0x790] ss:$48 sps:$4 sm:$0xff]   ;;  %v3947_v24 = vld [vmem:[#allocation5 + $0x134] ss:$48 sps:$4 sm:$0xff]  }
  0x71   :  { %2508 = vmatprep.subr.bf16.mxu1 %v3860_v25  ;;  %v3950_v25 = vld [vmem:[#allocation5 + $0x734] ss:$48 sps:$4 sm:$0xff]  }
  0x73   :  { %2466 = vmatpush1.bf16.msra.mxu0 %v3855_v26  ;;  %v3945_v26 = vld [vmem:[#allocation5 + $0x130] ss:$48 sps:$4 sm:$0xff]  }
  0x74   :  { %2509 = vmatpush1.bf16.msra.mxu1 %v3858_v27  ;;  %2467 = vmatprep.subr.bf16.mxu0 %v3863_v28  ;;  %v3956_v27 = vld [vmem:[#allocation5 + $0x6d4] ss:$48 sps:$4 sm:$0xff]   ;;  %v3951_v28 = vld [vmem:[#allocation5 + $0xd0] ss:$48 sps:$4 sm:$0xff]  }
  0x75   :  { %2510 = vmatprep.subr.bf16.mxu1 %v3866_v29  ;;  %v3954_v29 = vld [vmem:[#allocation5 + $0x6d0] ss:$48 sps:$4 sm:$0xff]  }
  0x77   :  { %2468 = vmatpush1.bf16.msra.mxu0 %v3861_v30  ;;  %v3959_v30 = vld [vmem:[#allocation5 + $0x74] ss:$48 sps:$4 sm:$0xff]  }
  0x78   :  { %2511 = vmatpush1.bf16.msra.mxu1 %v3864_v31  ;;  %2469 = vmatprep.subr.bf16.mxu0 %v3869_v32  ;;  %v3962_v31 = vld [vmem:[#allocation5 + $0x674] ss:$48 sps:$4 sm:$0xff]   ;;  %v3957_v32 = vld [vmem:[#allocation5 + $0x70] ss:$48 sps:$4 sm:$0xff]  }
  0x79   :  { %2512 = vmatprep.subr.bf16.mxu1 %v3872_v33  ;;  %v3960_v33 = vld [vmem:[#allocation5 + $0x670] ss:$48 sps:$4 sm:$0xff]  }
  0x7b   :  { %2470 = vmatpush1.bf16.msra.mxu0 %v3867_v34  ;;  %v3965_v34 = vld [vmem:[#allocation5 + $0x14] ss:$48 sps:$4 sm:$0xff]  }
  0x7c   :  { %2513 = vmatpush1.bf16.msra.mxu1 %v3870_v35  ;;  %2471 = vmatprep.subr.bf16.mxu0 %v3875_v36  ;;  %v3968_v35 = vld [vmem:[#allocation5 + $0x614] ss:$48 sps:$4 sm:$0xff]   ;;  %v3963_v36 = vld [vmem:[#allocation5 + $0x10] ss:$48 sps:$4 sm:$0xff]  }
  0x7d   :  { %2514 = vmatprep.subr.bf16.mxu1 %v3878_v37  ;;  %v3966_v37 = vld [vmem:[#allocation5 + $0x610] ss:$48 sps:$4 sm:$0xff]  }
  0x7f   :  { %2472 = vmatpush2.bf16.msra.mxu0 %v3873_v38  ;;  %v3971_v38 = vld [vmem:[#allocation5 + $0x5b4] ss:$48 sps:$4 sm:$0xff]  }
  0x80   :  { %2515 = vmatpush2.bf16.msra.mxu1 %v3876_v39  ;;  %2473 = vmatprep.subr.bf16.mxu0 %v3881_v40  ;;  %v3974_v39 = vld [vmem:[#allocation5 + $0xbb4] ss:$48 sps:$4 sm:$0xff]   ;;  %v3969_v40 = vld [vmem:[#allocation5 + $0x5b0] ss:$48 sps:$4 sm:$0xff]  }
  0x81   :  { %2516 = vmatprep.subr.bf16.mxu1 %v3884_v41  ;;  %v3972_v41 = vld [vmem:[#allocation5 + $0xbb0] ss:$48 sps:$4 sm:$0xff]  }
  0x83   :  { %2474 = vmatpush2.bf16.msra.mxu0 %v3879_v42  ;;  %v3977_v42 = vld [vmem:[#allocation5 + $0x554] ss:$48 sps:$4 sm:$0xff]  }
  0x84   :  { %2517 = vmatpush2.bf16.msra.mxu1 %v3882_v43  ;;  %2475 = vmatprep.subr.bf16.mxu0 %v3887_v44  ;;  %v3980_v43 = vld [vmem:[#allocation5 + $0xb54] ss:$48 sps:$4 sm:$0xff]   ;;  %v3975_v44 = vld [vmem:[#allocation5 + $0x550] ss:$48 sps:$4 sm:$0xff]  }
  0x85   :  { %2518 = vmatprep.subr.bf16.mxu1 %v3890_v45  ;;  %v3978_v45 = vld [vmem:[#allocation5 + $0xb50] ss:$48 sps:$4 sm:$0xff]  }
  0x87   :  { %2476 = vmatpush2.bf16.msra.mxu0 %v3885_v46  ;;  %v3983_v46 = vld [vmem:[#allocation5 + $0x4f4] ss:$48 sps:$4 sm:$0xff]  }
  0x88   :  { %2519 = vmatpush2.bf16.msra.mxu1 %v3888_v47  ;;  %2477 = vmatprep.subr.bf16.mxu0 %v3893_v49  ;;  %v3986_v47 = vld [vmem:[#allocation5 + $0xaf4] ss:$48 sps:$4 sm:$0xff]   ;;  %v3981_v49 = vld [vmem:[#allocation5 + $0x4f0] ss:$48 sps:$4 sm:$0xff]  }
  0x89   :  { %2520 = vmatprep.subr.bf16.mxu1 %v3896_v51  ;;  %v3984_v51 = vld [vmem:[#allocation5 + $0xaf0] ss:$48 sps:$4 sm:$0xff]  }
  0x8b   :  { %2478 = vmatpush2.bf16.msra.mxu0 %v3891_v52  ;;  %v3989_v52 = vld [vmem:[#allocation5 + $0x494] ss:$48 sps:$4 sm:$0xff]  }
  0x8c   :  { %2521 = vmatpush2.bf16.msra.mxu1 %v3894_v53  ;;  %2479 = vmatprep.subr.bf16.mxu0 %v3899_v54  ;;  %v3992_v53 = vld [vmem:[#allocation5 + $0xa94] ss:$48 sps:$4 sm:$0xff]   ;;  %v3987_v54 = vld [vmem:[#allocation5 + $0x490] ss:$48 sps:$4 sm:$0xff]  }
  0x8d   :  { %2522 = vmatprep.subr.bf16.mxu1 %v3902_v55  ;;  %v3990_v55 = vld [vmem:[#allocation5 + $0xa90] ss:$48 sps:$4 sm:$0xff]  }
  0x8f   :  { %2480 = vmatpush2.bf16.msra.mxu0 %v3897_v56  ;;  %v3995_v56 = vld [vmem:[#allocation5 + $0x434] ss:$48 sps:$4 sm:$0xff]  }
  0x90   :  { %2523 = vmatpush2.bf16.msra.mxu1 %v3900_v57  ;;  %2481 = vmatprep.subr.bf16.mxu0 %v3905_v58  ;;  %v3998_v57 = vld [vmem:[#allocation5 + $0xa34] ss:$48 sps:$4 sm:$0xff]   ;;  %v3993_v58 = vld [vmem:[#allocation5 + $0x430] ss:$48 sps:$4 sm:$0xff]  }
  0x91   :  { %2524 = vmatprep.subr.bf16.mxu1 %v3908_v59  ;;  %v3996_v59 = vld [vmem:[#allocation5 + $0xa30] ss:$48 sps:$4 sm:$0xff]  }
  0x93   :  { %2482 = vmatpush2.bf16.msra.mxu0 %v3903_v60  ;;  %v4001_v60 = vld [vmem:[#allocation5 + $0x3d4] ss:$48 sps:$4 sm:$0xff]  }
  0x94   :  { %2525 = vmatpush2.bf16.msra.mxu1 %v3906_v61  ;;  %2483 = vmatprep.subr.bf16.mxu0 %v3911_v62  ;;  %v4004_v61 = vld [vmem:[#allocation5 + $0x9d4] ss:$48 sps:$4 sm:$0xff]   ;;  %v3999_v62 = vld [vmem:[#allocation5 + $0x3d0] ss:$48 sps:$4 sm:$0xff]  }
  0x95   :  { %2526 = vmatprep.subr.bf16.mxu1 %v3914_v63  ;;  %v4002_v63 = vld [vmem:[#allocation5 + $0x9d0] ss:$48 sps:$4 sm:$0xff]  }
  0x97   :  { %2484 = vmatpush2.bf16.msra.mxu0 %v3909_v0  ;;  %v4007_v0 = vld [vmem:[#allocation5 + $0x374] ss:$48 sps:$4 sm:$0xff]  }
  0x98   :  { %2527 = vmatpush2.bf16.msra.mxu1 %v3912_v1  ;;  %2485 = vmatprep.subr.bf16.mxu0 %v3917_v2  ;;  %v4010_v1 = vld [vmem:[#allocation5 + $0x974] ss:$48 sps:$4 sm:$0xff]   ;;  %v4005_v2 = vld [vmem:[#allocation5 + $0x370] ss:$48 sps:$4 sm:$0xff]  }
  0x99   :  { %2528 = vmatprep.subr.bf16.mxu1 %v3920_v3  ;;  %v4008_v3 = vld [vmem:[#allocation5 + $0x970] ss:$48 sps:$4 sm:$0xff]  }
  0x9b   :  { %2486 = vmatpush2.bf16.msra.mxu0 %v3915_v6  ;;  %v4013_v6 = vld [vmem:[#allocation5 + $0x314] ss:$48 sps:$4 sm:$0xff]  }
  0x9c   :  { %2529 = vmatpush2.bf16.msra.mxu1 %v3918_v7  ;;  %2541 = vmatprep.subr.bf16.mxu0 %v3923_v8  ;;  %v4016_v7 = vld [vmem:[#allocation5 + $0x914] ss:$48 sps:$4 sm:$0xff]   ;;  %v4011_v8 = vld [vmem:[#allocation5 + $0x310] ss:$48 sps:$4 sm:$0xff]  }
  0x9d   :  { %2584 = vmatprep.subr.bf16.mxu1 %v3926_v9  ;;  %v4014_v9 = vld [vmem:[#allocation5 + $0x910] ss:$48 sps:$4 sm:$0xff]  }
  0x9e   :  { %2488 = vmatmul.mubr.bf16.vlgmr.msra.gmra.mxu0 %v4420_v4 }
  0x9f   :  { %2531 = vmatmul.mubr.bf16.vlgmr.msra.gmra.mxu1 %v4422_v5  ;;  %2542 = vmatpush1.bf16.msra.mxu0 %v3921_v10  ;;  %v4019_v10 = vld [vmem:[#allocation5 + $0x2bc] ss:$48 sps:$4 sm:$0xff]  }
  0xa0   :  { %2585 = vmatpush1.bf16.msra.mxu1 %v3924_v11  ;;  %2543 = vmatprep.subr.bf16.mxu0 %v3929_v12  ;;  %v4022_v11 = vld [vmem:[#allocation5 + $0x8bc] ss:$48 sps:$4 sm:$0xff]   ;;  %v4017_v12 = vld [vmem:[#allocation5 + $0x2b8] ss:$48 sps:$4 sm:$0xff]  }
  0xa1   :  { %2586 = vmatprep.subr.bf16.mxu1 %v3932_v13  ;;  %2573 = vmatprep.mubr.bf16.mxu0 %v4414_v48  ;;  %v3948_v48 = vld [vmem:[#allocation5 + $0x730] ss:$48 sps:$4 sm:$0xff]   ;;  %v4020_v13 = vld [vmem:[#allocation5 + $0x8b8] ss:$48 sps:$4 sm:$0xff]  }
  0xa2   :  { %2616 = vmatprep.mubr.bf16.mxu1 %v4416_v50  ;;  %v3953_v50 = vld [vmem:[#allocation5 + $0xd4] ss:$48 sps:$4 sm:$0xff]  }
  0xa3   :  { %2544 = vmatpush1.bf16.msra.mxu0 %v3927_v14  ;;  %v4025_v14 = vld [vmem:[#allocation5 + $0x25c] ss:$48 sps:$4 sm:$0xff]  }
  0xa4   :  { %2587 = vmatpush1.bf16.msra.mxu1 %v3930_v15  ;;  %2545 = vmatprep.subr.bf16.mxu0 %v3935_v16  ;;  %v4028_v15 = vld [vmem:[#allocation5 + $0x85c] ss:$48 sps:$4 sm:$0xff]   ;;  %v4023_v16 = vld [vmem:[#allocation5 + $0x258] ss:$48 sps:$4 sm:$0xff]  }
  0xa5   :  { %2588 = vmatprep.subr.bf16.mxu1 %v3938_v17  ;;  %v4026_v17 = vld [vmem:[#allocation5 + $0x858] ss:$48 sps:$4 sm:$0xff]  }
  0xa7   :  { %2546 = vmatpush1.bf16.msra.mxu0 %v3933_v18  ;;  %v4031_v18 = vld [vmem:[#allocation5 + $0x1fc] ss:$48 sps:$4 sm:$0xff]  }
  0xa8   :  { %2589 = vmatpush1.bf16.msra.mxu1 %v3936_v19  ;;  %2547 = vmatprep.subr.bf16.mxu0 %v3941_v20  ;;  %v4034_v19 = vld [vmem:[#allocation5 + $0x7fc] ss:$48 sps:$4 sm:$0xff]   ;;  %v4434_v20 = vld [vmem:[#allocation2 + $0x4] ss:$16 sps:$4 sm:$0xff]  }
  0xa9   :  { %2590 = vmatprep.subr.bf16.mxu1 %v3944_v21  ;;  %v4437_v21 = vld [vmem:[#allocation2 + $0xc] ss:$16 sps:$4 sm:$0xff]  }
  0xab   :  { %2548 = vmatpush1.bf16.msra.mxu0 %v3939_v22  ;;  %v4029_v22 = vld [vmem:[#allocation5 + $0x1f8] ss:$48 sps:$4 sm:$0xff]  }
  0xac   :  { %2591 = vmatpush1.bf16.msra.mxu1 %v3942_v23  ;;  %2549 = vmatprep.subr.bf16.mxu0 %v3947_v24  ;;  %v4040_v23 = vld [vmem:[#allocation5 + $0x79c] ss:$48 sps:$4 sm:$0xff]   ;;  %v4035_v24 = vld [vmem:[#allocation5 + $0x198] ss:$48 sps:$4 sm:$0xff]  }
  0xad   :  { %2592 = vmatprep.subr.bf16.mxu1 %v3950_v25  ;;  %v4038_v25 = vld [vmem:[#allocation5 + $0x798] ss:$48 sps:$4 sm:$0xff]  }
  0xaf   :  { %2550 = vmatpush1.bf16.msra.mxu0 %v3945_v26  ;;  %v4043_v26 = vld [vmem:[#allocation5 + $0x13c] ss:$48 sps:$4 sm:$0xff]  }
  0xb0   :  { %2593 = vmatpush1.bf16.msra.mxu1 %v3948_v48  ;;  %2551 = vmatprep.subr.bf16.mxu0 %v3953_v50  ;;  %v4046_v48 = vld [vmem:[#allocation5 + $0x73c] ss:$48 sps:$4 sm:$0xff]   ;;  %v4041_v50 = vld [vmem:[#allocation5 + $0x138] ss:$48 sps:$4 sm:$0xff]  }
  0xb1   :  { %2594 = vmatprep.subr.bf16.mxu1 %v3956_v27  ;;  %v4044_v27 = vld [vmem:[#allocation5 + $0x738] ss:$48 sps:$4 sm:$0xff]  }
  0xb3   :  { %2552 = vmatpush1.bf16.msra.mxu0 %v3951_v28  ;;  %v4049_v28 = vld [vmem:[#allocation5 + $0xdc] ss:$48 sps:$4 sm:$0xff]  }
  0xb4   :  { %2595 = vmatpush1.bf16.msra.mxu1 %v3954_v29  ;;  %2553 = vmatprep.subr.bf16.mxu0 %v3959_v30  ;;  %v4052_v29 = vld [vmem:[#allocation5 + $0x6dc] ss:$48 sps:$4 sm:$0xff]   ;;  %v4047_v30 = vld [vmem:[#allocation5 + $0xd8] ss:$48 sps:$4 sm:$0xff]  }
  0xb5   :  { %2596 = vmatprep.subr.bf16.mxu1 %v3962_v31  ;;  %v4050_v31 = vld [vmem:[#allocation5 + $0x6d8] ss:$48 sps:$4 sm:$0xff]  }
  0xb7   :  { %2554 = vmatpush1.bf16.msra.mxu0 %v3957_v32  ;;  %v4055_v32 = vld [vmem:[#allocation5 + $0x7c] ss:$48 sps:$4 sm:$0xff]  }
  0xb8   :  { %2597 = vmatpush1.bf16.msra.mxu1 %v3960_v33  ;;  %2555 = vmatprep.subr.bf16.mxu0 %v3965_v34  ;;  %v4058_v33 = vld [vmem:[#allocation5 + $0x67c] ss:$48 sps:$4 sm:$0xff]   ;;  %v4053_v34 = vld [vmem:[#allocation5 + $0x78] ss:$48 sps:$4 sm:$0xff]  }
  0xb9   :  { %2598 = vmatprep.subr.bf16.mxu1 %v3968_v35  ;;  %v4056_v35 = vld [vmem:[#allocation5 + $0x678] ss:$48 sps:$4 sm:$0xff]  }
  0xbb   :  { %2556 = vmatpush1.bf16.msra.mxu0 %v3963_v36  ;;  %v4061_v36 = vld [vmem:[#allocation5 + $0x1c] ss:$48 sps:$4 sm:$0xff]  }
  0xbc   :  { %2599 = vmatpush1.bf16.msra.mxu1 %v3966_v37  ;;  %2557 = vmatprep.subr.bf16.mxu0 %v3971_v38  ;;  %v4064_v37 = vld [vmem:[#allocation5 + $0x61c] ss:$48 sps:$4 sm:$0xff]   ;;  %v4059_v38 = vld [vmem:[#allocation5 + $0x18] ss:$48 sps:$4 sm:$0xff]  }
  0xbd   :  { %2600 = vmatprep.subr.bf16.mxu1 %v3974_v39  ;;  %v4062_v39 = vld [vmem:[#allocation5 + $0x618] ss:$48 sps:$4 sm:$0xff]  }
  0xbf   :  { %2558 = vmatpush2.bf16.msra.mxu0 %v3969_v40  ;;  %v4067_v40 = vld [vmem:[#allocation5 + $0x5bc] ss:$48 sps:$4 sm:$0xff]  }
  0xc0   :  { %2601 = vmatpush2.bf16.msra.mxu1 %v3972_v41  ;;  %2559 = vmatprep.subr.bf16.mxu0 %v3977_v42  ;;  %v4070_v41 = vld [vmem:[#allocation5 + $0xbbc] ss:$48 sps:$4 sm:$0xff]   ;;  %v4065_v42 = vld [vmem:[#allocation5 + $0x5b8] ss:$48 sps:$4 sm:$0xff]  }
  0xc1   :  { %2602 = vmatprep.subr.bf16.mxu1 %v3980_v43  ;;  %v4068_v43 = vld [vmem:[#allocation5 + $0xbb8] ss:$48 sps:$4 sm:$0xff]  }
  0xc3   :  { %2560 = vmatpush2.bf16.msra.mxu0 %v3975_v44  ;;  %v4073_v44 = vld [vmem:[#allocation5 + $0x55c] ss:$48 sps:$4 sm:$0xff]  }
  0xc4   :  { %2603 = vmatpush2.bf16.msra.mxu1 %v3978_v45  ;;  %2561 = vmatprep.subr.bf16.mxu0 %v3983_v46  ;;  %v4076_v45 = vld [vmem:[#allocation5 + $0xb5c] ss:$48 sps:$4 sm:$0xff]   ;;  %v4071_v46 = vld [vmem:[#allocation5 + $0x558] ss:$48 sps:$4 sm:$0xff]  }
  0xc5   :  { %2604 = vmatprep.subr.bf16.mxu1 %v3986_v47  ;;  %v4074_v47 = vld [vmem:[#allocation5 + $0xb58] ss:$48 sps:$4 sm:$0xff]  }
  0xc7   :  { %2562 = vmatpush2.bf16.msra.mxu0 %v3981_v49  ;;  %v4079_v49 = vld [vmem:[#allocation5 + $0x4fc] ss:$48 sps:$4 sm:$0xff]  }
  0xc8   :  { %2605 = vmatpush2.bf16.msra.mxu1 %v3984_v51  ;;  %2563 = vmatprep.subr.bf16.mxu0 %v3989_v52  ;;  %v4082_v51 = vld [vmem:[#allocation5 + $0xafc] ss:$48 sps:$4 sm:$0xff]   ;;  %v4077_v52 = vld [vmem:[#allocation5 + $0x4f8] ss:$48 sps:$4 sm:$0xff]  }
  0xc9   :  { %2606 = vmatprep.subr.bf16.mxu1 %v3992_v53  ;;  %v4080_v53 = vld [vmem:[#allocation5 + $0xaf8] ss:$48 sps:$4 sm:$0xff]  }
  0xcb   :  { %2564 = vmatpush2.bf16.msra.mxu0 %v3987_v54  ;;  %v4085_v54 = vld [vmem:[#allocation5 + $0x49c] ss:$48 sps:$4 sm:$0xff]  }
  0xcc   :  { %2607 = vmatpush2.bf16.msra.mxu1 %v3990_v55  ;;  %2565 = vmatprep.subr.bf16.mxu0 %v3995_v56  ;;  %v4088_v55 = vld [vmem:[#allocation5 + $0xa9c] ss:$48 sps:$4 sm:$0xff]   ;;  %v4083_v56 = vld [vmem:[#allocation5 + $0x498] ss:$48 sps:$4 sm:$0xff]  }
  0xcd   :  { %2608 = vmatprep.subr.bf16.mxu1 %v3998_v57  ;;  %v4086_v57 = vld [vmem:[#allocation5 + $0xa98] ss:$48 sps:$4 sm:$0xff]  }
  0xcf   :  { %2566 = vmatpush2.bf16.msra.mxu0 %v3993_v58  ;;  %v4091_v58 = vld [vmem:[#allocation5 + $0x43c] ss:$48 sps:$4 sm:$0xff]  }
  0xd0   :  { %2609 = vmatpush2.bf16.msra.mxu1 %v3996_v59  ;;  %2567 = vmatprep.subr.bf16.mxu0 %v4001_v60  ;;  %v4094_v59 = vld [vmem:[#allocation5 + $0xa3c] ss:$48 sps:$4 sm:$0xff]   ;;  %v4089_v60 = vld [vmem:[#allocation5 + $0x438] ss:$48 sps:$4 sm:$0xff]  }
  0xd1   :  { %2610 = vmatprep.subr.bf16.mxu1 %v4004_v61  ;;  %v4092_v61 = vld [vmem:[#allocation5 + $0xa38] ss:$48 sps:$4 sm:$0xff]  }
  0xd3   :  { %2568 = vmatpush2.bf16.msra.mxu0 %v3999_v62  ;;  %v4097_v62 = vld [vmem:[#allocation5 + $0x3dc] ss:$48 sps:$4 sm:$0xff]  }
  0xd4   :  { %2611 = vmatpush2.bf16.msra.mxu1 %v4002_v63  ;;  %2569 = vmatprep.subr.bf16.mxu0 %v4007_v0  ;;  %v4100_v63 = vld [vmem:[#allocation5 + $0x9dc] ss:$48 sps:$4 sm:$0xff]   ;;  %v4095_v0 = vld [vmem:[#allocation5 + $0x3d8] ss:$48 sps:$4 sm:$0xff]  }
  0xd5   :  { %2612 = vmatprep.subr.bf16.mxu1 %v4010_v1  ;;  %v4098_v1 = vld [vmem:[#allocation5 + $0x9d8] ss:$48 sps:$4 sm:$0xff]  }
  0xd7   :  { %2570 = vmatpush2.bf16.msra.mxu0 %v4005_v2  ;;  %v4103_v2 = vld [vmem:[#allocation5 + $0x37c] ss:$48 sps:$4 sm:$0xff]  }
  0xd8   :  { %2613 = vmatpush2.bf16.msra.mxu1 %v4008_v3  ;;  %2571 = vmatprep.subr.bf16.mxu0 %v4013_v6  ;;  %v4106_v3 = vld [vmem:[#allocation5 + $0x97c] ss:$48 sps:$4 sm:$0xff]   ;;  %v4101_v6 = vld [vmem:[#allocation5 + $0x378] ss:$48 sps:$4 sm:$0xff]  }
  0xd9   :  { %2614 = vmatprep.subr.bf16.mxu1 %v4016_v7  ;;  %v4104_v7 = vld [vmem:[#allocation5 + $0x978] ss:$48 sps:$4 sm:$0xff]  }
  0xdb   :  { %2572 = vmatpush2.bf16.msra.mxu0 %v4011_v8  ;;  %v4109_v8 = vld [vmem:[#allocation5 + $0x31c] ss:$48 sps:$4 sm:$0xff]  }
  0xdc   :  { %2615 = vmatpush2.bf16.msra.mxu1 %v4014_v9  ;;  %2627 = vmatprep.subr.bf16.mxu0 %v4019_v10  ;;  %v4112_v9 = vld [vmem:[#allocation5 + $0x91c] ss:$48 sps:$4 sm:$0xff]   ;;  %v4107_v10 = vld [vmem:[#allocation5 + $0x318] ss:$48 sps:$4 sm:$0xff]  }
  0xdd   :  { %2670 = vmatprep.subr.bf16.mxu1 %v4022_v11  ;;  %v4110_v11 = vld [vmem:[#allocation5 + $0x918] ss:$48 sps:$4 sm:$0xff]  }
  0xde   :  { %2574 = vmatmul.mubr.bf16.vlgmr.msra.gmra.mxu0 %v4420_v4  ;;  %v4032_v4 = vld [vmem:[#allocation5 + $0x7f8] ss:$48 sps:$4 sm:$0xff]  }
  0xdf   :  { %2617 = vmatmul.mubr.bf16.vlgmr.msra.gmra.mxu1 %v4422_v5  ;;  %2628 = vmatpush1.bf16.msra.mxu0 %v4017_v12  ;;  %v4037_v5 = vld [vmem:[#allocation5 + $0x19c] ss:$48 sps:$4 sm:$0xff]   ;;  %v4115_v12 = vld [vmem:[#allocation5 + $0x2c4] ss:$48 sps:$4 sm:$0xff]  }
  0xe0   :  { %2671 = vmatpush1.bf16.msra.mxu1 %v4020_v13  ;;  %2629 = vmatprep.subr.bf16.mxu0 %v4025_v14  ;;  %v4118_v13 = vld [vmem:[#allocation5 + $0x8c4] ss:$48 sps:$4 sm:$0xff]   ;;  %v4113_v14 = vld [vmem:[#allocation5 + $0x2c0] ss:$48 sps:$4 sm:$0xff]  }
  0xe1   :  { %2672 = vmatprep.subr.bf16.mxu1 %v4028_v15  ;;  %2659 = vmatprep.mubr.bf16.mxu0 %v4434_v20  ;;  %v4116_v15 = vld [vmem:[#allocation5 + $0x8c0] ss:$48 sps:$4 sm:$0xff]  }
  0xe2   :  { %2702 = vmatprep.mubr.bf16.mxu1 %v4437_v21 }
  0xe3   :  { %2630 = vmatpush1.bf16.msra.mxu0 %v4023_v16  ;;  %v4121_v16 = vld [vmem:[#allocation5 + $0x264] ss:$48 sps:$4 sm:$0xff]  }
  0xe4   :  { %2673 = vmatpush1.bf16.msra.mxu1 %v4026_v17  ;;  %2631 = vmatprep.subr.bf16.mxu0 %v4031_v18  ;;  %v4124_v17 = vld [vmem:[#allocation5 + $0x864] ss:$48 sps:$4 sm:$0xff]   ;;  %v4440_v18 = vld [vmem:[#allocation2] ss:$16 sps:$4 sm:$0xff]  }
  0xe5   :  { %2674 = vmatprep.subr.bf16.mxu1 %v4034_v19  ;;  %v4443_v19 = vld [vmem:[#allocation2 + $0x8] ss:$16 sps:$4 sm:$0xff]  }
  0xe7   :  { %2632 = vmatpush1.bf16.msra.mxu0 %v4029_v22  ;;  %v4119_v22 = vld [vmem:[#allocation5 + $0x260] ss:$48 sps:$4 sm:$0xff]  }
  0xe8   :  { %2675 = vmatpush1.bf16.msra.mxu1 %v4032_v4  ;;  %2633 = vmatprep.subr.bf16.mxu0 %v4037_v5  ;;  %v4122_v4 = vld [vmem:[#allocation5 + $0x860] ss:$48 sps:$4 sm:$0xff]   ;;  %v4127_v5 = vld [vmem:[#allocation5 + $0x204] ss:$48 sps:$4 sm:$0xff]  }
  0xe9   :  { %2676 = vmatprep.subr.bf16.mxu1 %v4040_v23  ;;  %v4130_v23 = vld [vmem:[#allocation5 + $0x804] ss:$48 sps:$4 sm:$0xff]  }
  0xeb   :  { %2634 = vmatpush1.bf16.msra.mxu0 %v4035_v24  ;;  %v4125_v24 = vld [vmem:[#allocation5 + $0x200] ss:$48 sps:$4 sm:$0xff]  }
  0xec   :  { %2677 = vmatpush1.bf16.msra.mxu1 %v4038_v25  ;;  %2635 = vmatprep.subr.bf16.mxu0 %v4043_v26  ;;  %v4128_v25 = vld [vmem:[#allocation5 + $0x800] ss:$48 sps:$4 sm:$0xff]   ;;  %v4133_v26 = vld [vmem:[#allocation5 + $0x1a4] ss:$48 sps:$4 sm:$0xff]  }
  0xed   :  { %2678 = vmatprep.subr.bf16.mxu1 %v4046_v48  ;;  %v4136_v48 = vld [vmem:[#allocation5 + $0x7a4] ss:$48 sps:$4 sm:$0xff]  }
  0xef   :  { %2636 = vmatpush1.bf16.msra.mxu0 %v4041_v50  ;;  %v4131_v50 = vld [vmem:[#allocation5 + $0x1a0] ss:$48 sps:$4 sm:$0xff]  }
  0xf0   :  { %2679 = vmatpush1.bf16.msra.mxu1 %v4044_v27  ;;  %2637 = vmatprep.subr.bf16.mxu0 %v4049_v28  ;;  %v4134_v27 = vld [vmem:[#allocation5 + $0x7a0] ss:$48 sps:$4 sm:$0xff]   ;;  %v4139_v28 = vld [vmem:[#allocation5 + $0x144] ss:$48 sps:$4 sm:$0xff]  }
  0xf1   :  { %2680 = vmatprep.subr.bf16.mxu1 %v4052_v29  ;;  %v4142_v29 = vld [vmem:[#allocation5 + $0x744] ss:$48 sps:$4 sm:$0xff]  }
  0xf3   :  { %2638 = vmatpush1.bf16.msra.mxu0 %v4047_v30  ;;  %v4137_v30 = vld [vmem:[#allocation5 + $0x140] ss:$48 sps:$4 sm:$0xff]  }
  0xf4   :  { %2681 = vmatpush1.bf16.msra.mxu1 %v4050_v31  ;;  %2639 = vmatprep.subr.bf16.mxu0 %v4055_v32  ;;  %v4140_v31 = vld [vmem:[#allocation5 + $0x740] ss:$48 sps:$4 sm:$0xff]   ;;  %v4145_v32 = vld [vmem:[#allocation5 + $0xe4] ss:$48 sps:$4 sm:$0xff]  }
  0xf5   :  { %2682 = vmatprep.subr.bf16.mxu1 %v4058_v33  ;;  %v4148_v33 = vld [vmem:[#allocation5 + $0x6e4] ss:$48 sps:$4 sm:$0xff]  }
  0xf7   :  { %2640 = vmatpush1.bf16.msra.mxu0 %v4053_v34  ;;  %v4143_v34 = vld [vmem:[#allocation5 + $0xe0] ss:$48 sps:$4 sm:$0xff]  }
  0xf8   :  { %2683 = vmatpush1.bf16.msra.mxu1 %v4056_v35  ;;  %2641 = vmatprep.subr.bf16.mxu0 %v4061_v36  ;;  %v4146_v35 = vld [vmem:[#allocation5 + $0x6e0] ss:$48 sps:$4 sm:$0xff]   ;;  %v4151_v36 = vld [vmem:[#allocation5 + $0x84] ss:$48 sps:$4 sm:$0xff]  }
  0xf9   :  { %2684 = vmatprep.subr.bf16.mxu1 %v4064_v37  ;;  %v4154_v37 = vld [vmem:[#allocation5 + $0x684] ss:$48 sps:$4 sm:$0xff]  }
  0xfb   :  { %2642 = vmatpush1.bf16.msra.mxu0 %v4059_v38  ;;  %v4149_v38 = vld [vmem:[#allocation5 + $0x80] ss:$48 sps:$4 sm:$0xff]  }
  0xfc   :  { %2685 = vmatpush1.bf16.msra.mxu1 %v4062_v39  ;;  %2643 = vmatprep.subr.bf16.mxu0 %v4067_v40  ;;  %v4152_v39 = vld [vmem:[#allocation5 + $0x680] ss:$48 sps:$4 sm:$0xff]   ;;  %v4157_v40 = vld [vmem:[#allocation5 + $0x24] ss:$48 sps:$4 sm:$0xff]  }
  0xfd   :  { %2686 = vmatprep.subr.bf16.mxu1 %v4070_v41  ;;  %v4160_v41 = vld [vmem:[#allocation5 + $0x624] ss:$48 sps:$4 sm:$0xff]  }
  0xff   :  { %2644 = vmatpush2.bf16.msra.mxu0 %v4065_v42  ;;  %v4155_v42 = vld [vmem:[#allocation5 + $0x20] ss:$48 sps:$4 sm:$0xff]  }
 0x100   :  { %2687 = vmatpush2.bf16.msra.mxu1 %v4068_v43  ;;  %2645 = vmatprep.subr.bf16.mxu0 %v4073_v44  ;;  %v4158_v43 = vld [vmem:[#allocation5 + $0x620] ss:$48 sps:$4 sm:$0xff]   ;;  %v4163_v44 = vld [vmem:[#allocation5 + $0x5c4] ss:$48 sps:$4 sm:$0xff]  }
 0x101   :  { %2688 = vmatprep.subr.bf16.mxu1 %v4076_v45  ;;  %v4166_v45 = vld [vmem:[#allocation5 + $0xbc4] ss:$48 sps:$4 sm:$0xff]  }
 0x103   :  { %2646 = vmatpush2.bf16.msra.mxu0 %v4071_v46  ;;  %v4161_v46 = vld [vmem:[#allocation5 + $0x5c0] ss:$48 sps:$4 sm:$0xff]  }
 0x104   :  { %2689 = vmatpush2.bf16.msra.mxu1 %v4074_v47  ;;  %2647 = vmatprep.subr.bf16.mxu0 %v4079_v49  ;;  %v4164_v47 = vld [vmem:[#allocation5 + $0xbc0] ss:$48 sps:$4 sm:$0xff]   ;;  %v4169_v49 = vld [vmem:[#allocation5 + $0x564] ss:$48 sps:$4 sm:$0xff]  }
 0x105   :  { %2690 = vmatprep.subr.bf16.mxu1 %v4082_v51  ;;  %v4172_v51 = vld [vmem:[#allocation5 + $0xb64] ss:$48 sps:$4 sm:$0xff]  }
 0x107   :  { %2648 = vmatpush2.bf16.msra.mxu0 %v4077_v52  ;;  %v4167_v52 = vld [vmem:[#allocation5 + $0x560] ss:$48 sps:$4 sm:$0xff]  }
 0x108   :  { %2691 = vmatpush2.bf16.msra.mxu1 %v4080_v53  ;;  %2649 = vmatprep.subr.bf16.mxu0 %v4085_v54  ;;  %v4170_v53 = vld [vmem:[#allocation5 + $0xb60] ss:$48 sps:$4 sm:$0xff]   ;;  %v4175_v54 = vld [vmem:[#allocation5 + $0x504] ss:$48 sps:$4 sm:$0xff]  }
 0x109   :  { %2692 = vmatprep.subr.bf16.mxu1 %v4088_v55  ;;  %v4178_v55 = vld [vmem:[#allocation5 + $0xb04] ss:$48 sps:$4 sm:$0xff]  }
 0x10b   :  { %2650 = vmatpush2.bf16.msra.mxu0 %v4083_v56  ;;  %v4173_v56 = vld [vmem:[#allocation5 + $0x500] ss:$48 sps:$4 sm:$0xff]  }
 0x10c   :  { %2693 = vmatpush2.bf16.msra.mxu1 %v4086_v57  ;;  %2651 = vmatprep.subr.bf16.mxu0 %v4091_v58  ;;  %v4176_v57 = vld [vmem:[#allocation5 + $0xb00] ss:$48 sps:$4 sm:$0xff]   ;;  %v4181_v58 = vld [vmem:[#allocation5 + $0x4a4] ss:$48 sps:$4 sm:$0xff]  }
 0x10d   :  { %2694 = vmatprep.subr.bf16.mxu1 %v4094_v59  ;;  %v4184_v59 = vld [vmem:[#allocation5 + $0xaa4] ss:$48 sps:$4 sm:$0xff]  }
 0x10f   :  { %2652 = vmatpush2.bf16.msra.mxu0 %v4089_v60  ;;  %v4179_v60 = vld [vmem:[#allocation5 + $0x4a0] ss:$48 sps:$4 sm:$0xff]  }
 0x110   :  { %2695 = vmatpush2.bf16.msra.mxu1 %v4092_v61  ;;  %2653 = vmatprep.subr.bf16.mxu0 %v4097_v62  ;;  %v4182_v61 = vld [vmem:[#allocation5 + $0xaa0] ss:$48 sps:$4 sm:$0xff]   ;;  %v4187_v62 = vld [vmem:[#allocation5 + $0x444] ss:$48 sps:$4 sm:$0xff]  }
 0x111   :  { %2696 = vmatprep.subr.bf16.mxu1 %v4100_v63  ;;  %v4190_v63 = vld [vmem:[#allocation5 + $0xa44] ss:$48 sps:$4 sm:$0xff]  }
 0x113   :  { %2654 = vmatpush2.bf16.msra.mxu0 %v4095_v0  ;;  %v4185_v0 = vld [vmem:[#allocation5 + $0x440] ss:$48 sps:$4 sm:$0xff]  }
 0x114   :  { %2697 = vmatpush2.bf16.msra.mxu1 %v4098_v1  ;;  %2655 = vmatprep.subr.bf16.mxu0 %v4103_v2  ;;  %v4188_v1 = vld [vmem:[#allocation5 + $0xa40] ss:$48 sps:$4 sm:$0xff]   ;;  %v4193_v2 = vld [vmem:[#allocation5 + $0x3e4] ss:$48 sps:$4 sm:$0xff]  }
 0x115   :  { %2698 = vmatprep.subr.bf16.mxu1 %v4106_v3  ;;  %v4196_v3 = vld [vmem:[#allocation5 + $0x9e4] ss:$48 sps:$4 sm:$0xff]  }
 0x117   :  { %2656 = vmatpush2.bf16.msra.mxu0 %v4101_v6  ;;  %v4191_v6 = vld [vmem:[#allocation5 + $0x3e0] ss:$48 sps:$4 sm:$0xff]  }
 0x118   :  { %2699 = vmatpush2.bf16.msra.mxu1 %v4104_v7  ;;  %2657 = vmatprep.subr.bf16.mxu0 %v4109_v8  ;;  %v4194_v7 = vld [vmem:[#allocation5 + $0x9e0] ss:$48 sps:$4 sm:$0xff]  }
 0x119   :  { %2700 = vmatprep.subr.bf16.mxu1 %v4112_v9 }
 0x11b   :  { %2658 = vmatpush2.bf16.msra.mxu0 %v4107_v10  ;;  %v4199_v10 = vld [vmem:[#allocation5 + $0x384] ss:$48 sps:$4 sm:$0xff]  }
 0x11c   :  { %2701 = vmatpush2.bf16.msra.mxu1 %v4110_v11  ;;  %2713 = vmatprep.subr.bf16.mxu0 %v4115_v12  ;;  %v4202_v11 = vld [vmem:[#allocation5 + $0x984] ss:$48 sps:$4 sm:$0xff]   ;;  %v4197_v12 = vld [vmem:[#allocation5 + $0x380] ss:$48 sps:$4 sm:$0xff]  }
 0x11d   :  { %2756 = vmatprep.subr.bf16.mxu1 %v4118_v13  ;;  %v4200_v13 = vld [vmem:[#allocation5 + $0x980] ss:$48 sps:$4 sm:$0xff]  }
 0x11e   :  { %2660 = vmatmul.mubr.bf16.vlgmr.msra.gmra.mxu0 %v4440_v18  ;;  %v4448_v8 = vpop.f32.mrf.mxu0 }
 0x11f   :  { %2703 = vmatmul.mubr.bf16.vlgmr.msra.gmra.mxu1 %v4443_v19  ;;  %2714 = vmatpush1.bf16.msra.mxu0 %v4113_v14  ;;  %v4450_v9 = vpop.f32.mrf.mxu1 }
 0x120   :  { %2757 = vmatpush1.bf16.msra.mxu1 %v4116_v15  ;;  %2715 = vmatprep.subr.bf16.mxu0 %v4121_v16  ;;  %v4452_v14 = vpop.f32.mrf.mxu0  ;;  %v4205_v16 = vld [vmem:[#allocation5 + $0x324] ss:$48 sps:$4 sm:$0xff]  }
 0x121   :  { %2758 = vmatprep.subr.bf16.mxu1 %v4124_v17  ;;  %2745 = vmatprep.mubr.bf16.mxu0 %v4434_v20  ;;  %v4454_v15 = vpop.f32.mrf.mxu1  ;;  %v4208_v17 = vld [vmem:[#allocation5 + $0x924] ss:$48 sps:$4 sm:$0xff]  }
 0x122   :  { %2788 = vmatprep.mubr.bf16.mxu1 %v4437_v21 }
 0x123   :  { %2716 = vmatpush1.bf16.msra.mxu0 %v4119_v22  ;;  %v4203_v22 = vld [vmem:[#allocation5 + $0x320] ss:$48 sps:$4 sm:$0xff]  }
 0x124   :  { %2759 = vmatpush1.bf16.msra.mxu1 %v4122_v4  ;;  %2717 = vmatprep.subr.bf16.mxu0 %v4127_v5  ;;  %v4206_v4 = vld [vmem:[#allocation5 + $0x920] ss:$48 sps:$4 sm:$0xff]   ;;  %v4456_v5 = vpop.f32.mrf.mxu0 }
 0x125   :  { %2760 = vmatprep.subr.bf16.mxu1 %v4130_v23  ;;  %v4458_v23 = vpop.f32.mrf.mxu1 }
 0x127   :  { %2718 = vmatpush1.bf16.msra.mxu0 %v4125_v24  ;;  %v4211_v24 = vld [vmem:[#allocation5 + $0x2cc] ss:$48 sps:$4 sm:$0xff]  }
 0x128   :  { %2761 = vmatpush1.bf16.msra.mxu1 %v4128_v25  ;;  %2719 = vmatprep.subr.bf16.mxu0 %v4133_v26  ;;  %v4214_v25 = vld [vmem:[#allocation5 + $0x8cc] ss:$48 sps:$4 sm:$0xff]   ;;  %v4209_v26 = vld [vmem:[#allocation5 + $0x2c8] ss:$48 sps:$4 sm:$0xff]  }
 0x129   :  { %2762 = vmatprep.subr.bf16.mxu1 %v4136_v48  ;;  %v4212_v48 = vld [vmem:[#allocation5 + $0x8c8] ss:$48 sps:$4 sm:$0xff]  }
 0x12b   :  { %2720 = vmatpush1.bf16.msra.mxu0 %v4131_v50  ;;  %v4460_v50 = vpop.f32.mrf.mxu0 }
 0x12c   :  { %2763 = vmatpush1.bf16.msra.mxu1 %v4134_v27  ;;  %2721 = vmatprep.subr.bf16.mxu0 %v4139_v28  ;;  %v4462_v27 = vpop.f32.mrf.mxu1  ;;  %v4217_v28 = vld [vmem:[#allocation5 + $0x26c] ss:$48 sps:$4 sm:$0xff]  }
 0x12d   :  { %2764 = vmatprep.subr.bf16.mxu1 %v4142_v29  ;;  %v4220_v29 = vld [vmem:[#allocation5 + $0x86c] ss:$48 sps:$4 sm:$0xff]  }
 0x12f   :  { %2722 = vmatpush1.bf16.msra.mxu0 %v4137_v30 }
 0x130   :  { %2765 = vmatpush1.bf16.msra.mxu1 %v4140_v31  ;;  %2723 = vmatprep.subr.bf16.mxu0 %v4145_v32 }
 0x131   :  { %2766 = vmatprep.subr.bf16.mxu1 %v4148_v33  ;;  %v4215_v33 = vld [vmem:[#allocation5 + $0x268] ss:$48 sps:$4 sm:$0xff]  }
 0x133   :  { %2724 = vmatpush1.bf16.msra.mxu0 %v4143_v34  ;;  %v4218_v34 = vld [vmem:[#allocation5 + $0x868] ss:$48 sps:$4 sm:$0xff]  }
 0x134   :  { %2767 = vmatpush1.bf16.msra.mxu1 %v4146_v35  ;;  %2725 = vmatprep.subr.bf16.mxu0 %v4151_v36 }
 0x135   :  { %2768 = vmatprep.subr.bf16.mxu1 %v4154_v37  ;;  %v4223_v37 = vld [vmem:[#allocation5 + $0x20c] ss:$48 sps:$4 sm:$0xff]  }
 0x137   :  { %2726 = vmatpush1.bf16.msra.mxu0 %v4149_v38  ;;  %v4226_v38 = vld [vmem:[#allocation5 + $0x80c] ss:$48 sps:$4 sm:$0xff]  }
 0x138   :  { %2769 = vmatpush1.bf16.msra.mxu1 %v4152_v39  ;;  %2727 = vmatprep.subr.bf16.mxu0 %v4157_v40 }
 0x139   :  { %2770 = vmatprep.subr.bf16.mxu1 %v4160_v41 }
 0x13b   :  { %2728 = vmatpush1.bf16.msra.mxu0 %v4155_v42  ;;  %v4221_v42 = vld [vmem:[#allocation5 + $0x208] ss:$48 sps:$4 sm:$0xff]  }
 0x13c   :  { %2771 = vmatpush1.bf16.msra.mxu1 %v4158_v43  ;;  %2729 = vmatprep.subr.bf16.mxu0 %v4163_v44  ;;  %v4224_v43 = vld [vmem:[#allocation5 + $0x808] ss:$48 sps:$4 sm:$0xff]  }
 0x13d   :  { %2772 = vmatprep.subr.bf16.mxu1 %v4166_v45 }
 0x13f   :  { %2730 = vmatpush2.bf16.msra.mxu0 %v4161_v46  ;;  %v4229_v46 = vld [vmem:[#allocation5 + $0x1ac] ss:$48 sps:$4 sm:$0xff]  }
 0x140   :  { %2773 = vmatpush2.bf16.msra.mxu1 %v4164_v47  ;;  %2731 = vmatprep.subr.bf16.mxu0 %v4169_v49  ;;  %v4232_v47 = vld [vmem:[#allocation5 + $0x7ac] ss:$48 sps:$4 sm:$0xff]  }
 0x141   :  { %2774 = vmatprep.subr.bf16.mxu1 %v4172_v51  ;;  %v4235_v51 = vld [vmem:[#allocation5 + $0x14c] ss:$48 sps:$4 sm:$0xff]  }
 0x143   :  { %2732 = vmatpush2.bf16.msra.mxu0 %v4167_v52  ;;  %v4238_v52 = vld [vmem:[#allocation5 + $0x74c] ss:$48 sps:$4 sm:$0xff]  }
 0x144   :  { %2775 = vmatpush2.bf16.msra.mxu1 %v4170_v53  ;;  %2733 = vmatprep.subr.bf16.mxu0 %v4175_v54  ;;  %v4233_v53 = vld [vmem:[#allocation5 + $0x148] ss:$48 sps:$4 sm:$0xff]  }
 0x145   :  { %2776 = vmatprep.subr.bf16.mxu1 %v4178_v55  ;;  %v4236_v54 = vld [vmem:[#allocation5 + $0x748] ss:$48 sps:$4 sm:$0xff]   ;;  %v4241_v55 = vld [vmem:[#allocation5 + $0xec] ss:$48 sps:$4 sm:$0xff]  }
 0x147   :  { %2734 = vmatpush2.bf16.msra.mxu0 %v4173_v56  ;;  %v4244_v56 = vld [vmem:[#allocation5 + $0x6ec] ss:$48 sps:$4 sm:$0xff]  }
 0x148   :  { %2777 = vmatpush2.bf16.msra.mxu1 %v4176_v57  ;;  %2735 = vmatprep.subr.bf16.mxu0 %v4181_v58  ;;  %v4239_v57 = vld [vmem:[#allocation5 + $0xe8] ss:$48 sps:$4 sm:$0xff]  }
 0x149   :  { %2778 = vmatprep.subr.bf16.mxu1 %v4184_v59  ;;  %v4242_v58 = vld [vmem:[#allocation5 + $0x6e8] ss:$48 sps:$4 sm:$0xff]   ;;  %v4247_v59 = vld [vmem:[#allocation5 + $0x8c] ss:$48 sps:$4 sm:$0xff]  }
 0x14b   :  { %2736 = vmatpush2.bf16.msra.mxu0 %v4179_v60  ;;  %v4250_v60 = vld [vmem:[#allocation5 + $0x68c] ss:$48 sps:$4 sm:$0xff]  }
 0x14c   :  { %2779 = vmatpush2.bf16.msra.mxu1 %v4182_v61  ;;  %2737 = vmatprep.subr.bf16.mxu0 %v4187_v62  ;;  %v4245_v61 = vld [vmem:[#allocation5 + $0x88] ss:$48 sps:$4 sm:$0xff]  }
 0x14d   :  { %2780 = vmatprep.subr.bf16.mxu1 %v4190_v63  ;;  %v4248_v62 = vld [vmem:[#allocation5 + $0x688] ss:$48 sps:$4 sm:$0xff]   ;;  %v4253_v63 = vld [vmem:[#allocation5 + $0x2c] ss:$48 sps:$4 sm:$0xff]  }
 0x14f   :  { %2738 = vmatpush2.bf16.msra.mxu0 %v4185_v0  ;;  %v4256_v0 = vld [vmem:[#allocation5 + $0x62c] ss:$48 sps:$4 sm:$0xff]  }
 0x150   :  { %2781 = vmatpush2.bf16.msra.mxu1 %v4188_v1  ;;  %2739 = vmatprep.subr.bf16.mxu0 %v4193_v2  ;;  %v4251_v1 = vld [vmem:[#allocation5 + $0x28] ss:$48 sps:$4 sm:$0xff]  }
 0x151   :  { %2782 = vmatprep.subr.bf16.mxu1 %v4196_v3  ;;  %v4254_v2 = vld [vmem:[#allocation5 + $0x628] ss:$48 sps:$4 sm:$0xff]   ;;  %v4259_v3 = vld [vmem:[#allocation5 + $0x5cc] ss:$48 sps:$4 sm:$0xff]  }
 0x153   :  { %2740 = vmatpush2.bf16.msra.mxu0 %v4191_v6  ;;  %v4262_v6 = vld [vmem:[#allocation5 + $0xbcc] ss:$48 sps:$4 sm:$0xff]  }
 0x154   :  { %2783 = vmatpush2.bf16.msra.mxu1 %v4194_v7  ;;  %2741 = vmatprep.subr.bf16.mxu0 %v4199_v10  ;;  %v4257_v7 = vld [vmem:[#allocation5 + $0x5c8] ss:$48 sps:$4 sm:$0xff]  }
 0x155   :  { %2784 = vmatprep.subr.bf16.mxu1 %v4202_v11  ;;  %v4260_v10 = vld [vmem:[#allocation5 + $0xbc8] ss:$48 sps:$4 sm:$0xff]   ;;  %v4265_v11 = vld [vmem:[#allocation5 + $0x56c] ss:$48 sps:$4 sm:$0xff]  }
 0x157   :  { %2742 = vmatpush2.bf16.msra.mxu0 %v4197_v12  ;;  %v4268_v12 = vld [vmem:[#allocation5 + $0xb6c] ss:$48 sps:$4 sm:$0xff]  }
 0x158   :  { %2785 = vmatpush2.bf16.msra.mxu1 %v4200_v13  ;;  %2743 = vmatprep.subr.bf16.mxu0 %v4205_v16  ;;  %v4263_v13 = vld [vmem:[#allocation5 + $0x568] ss:$48 sps:$4 sm:$0xff]  }
 0x159   :  { %2786 = vmatprep.subr.bf16.mxu1 %v4208_v17  ;;  %v4266_v16 = vld [vmem:[#allocation5 + $0xb68] ss:$48 sps:$4 sm:$0xff]   ;;  %v4271_v17 = vld [vmem:[#allocation5 + $0x50c] ss:$48 sps:$4 sm:$0xff]  }
 0x15b   :  { %2744 = vmatpush2.bf16.msra.mxu0 %v4203_v22  ;;  %v4274_v22 = vld [vmem:[#allocation5 + $0xb0c] ss:$48 sps:$4 sm:$0xff]  }
 0x15c   :  { %2787 = vmatpush2.bf16.msra.mxu1 %v4206_v4  ;;  %2799 = vmatprep.subr.bf16.mxu0 %v4211_v24  ;;  %v4269_v4 = vld [vmem:[#allocation5 + $0x508] ss:$48 sps:$4 sm:$0xff]  }
 0x15d   :  { %2842 = vmatprep.subr.bf16.mxu1 %v4214_v25  ;;  %v4272_v24 = vld [vmem:[#allocation5 + $0xb08] ss:$48 sps:$4 sm:$0xff]   ;;  %v4277_v25 = vld [vmem:[#allocation5 + $0x4ac] ss:$48 sps:$4 sm:$0xff]  }
 0x15e   :  { %v2489_v30 = vpop.f32.mrf.mxu0  ;;  %2746 = vmatmul.mubr.bf16.vlgmr.msra.gmra.mxu0 %v4440_v18 }
 0x15f   :  { %v2532_v31 = vpop.f32.mrf.mxu1  ;;  %2789 = vmatmul.mubr.bf16.vlgmr.msra.gmra.mxu1 %v4443_v19  ;;  %2800 = vmatpush1.bf16.msra.mxu0 %v4209_v26  ;;  %v4280_v26 = vld [vmem:[#allocation5 + $0xaac] ss:$48 sps:$4 sm:$0xff]  }
 0x160   :  { %v4466_v32 = vadd.f32 %v2532_v31, %v2489_v30  ;;  %2843 = vmatpush1.bf16.msra.mxu1 %v4212_v48  ;;  %v4468_v35 = vpop.f32.mrf.mxu0  ;;  %2801 = vmatprep.subr.bf16.mxu0 %v4217_v28  ;;  %v4275_v48 = vld [vmem:[#allocation5 + $0x4a8] ss:$48 sps:$4 sm:$0xff]   ;;  %v4286_v30 = vld [vmem:[#allocation5 + $0xa4c] ss:$48 sps:$4 sm:$0xff]  }
 0x161   :  { %v4470_v36 = vpop.f32.mrf.mxu1  ;;  %2844 = vmatprep.subr.bf16.mxu1 %v4220_v29  ;;  %2831 = vmatprep.mubr.bf16.mxu0 %v4434_v20  ;;  %v4227_v20 = vld [vmem:[#allocation5 + $0x1a8] ss:$48 sps:$4 sm:$0xff]   ;;  %v4283_v29 = vld [vmem:[#allocation5 + $0x44c] ss:$48 sps:$4 sm:$0xff]  }
 0x162   :  { %2874 = vmatprep.mubr.bf16.mxu1 %v4437_v21  ;;  %v2493_v39 = vpop.f32.mrf.mxu0  ;;  %v4230_v21 = vld [vmem:[#allocation5 + $0x7a8] ss:$48 sps:$4 sm:$0xff]  }
 0x163   :  { %v2536_v40 = vpop.f32.mrf.mxu1  ;;  %2802 = vmatpush1.bf16.msra.mxu0 %v4215_v33  ;;  %v4278_v28 = vld [vmem:[#allocation5 + $0xaa8] ss:$48 sps:$4 sm:$0xff]  }
 0x164   :  { %v4474_v41 = vadd.f32 %v2536_v40, %v2493_v39  ;;  %2845 = vmatpush1.bf16.msra.mxu1 %v4218_v34  ;;  %v2495_v44 = vpop.f32.mrf.mxu0  ;;  %2803 = vmatprep.subr.bf16.mxu0 %v4223_v37  ;;  %v4281_v31 = vld [vmem:[#allocation5 + $0x448] ss:$48 sps:$4 sm:$0xff]   ;;  %v4289_v34 = vld [vmem:[#allocation5 + $0x3ec] ss:$48 sps:$4 sm:$0xff]  }
 0x165   :  { %v2538_v45 = vpop.f32.mrf.mxu1  ;;  %2846 = vmatprep.subr.bf16.mxu1 %v4226_v38  ;;  %v4284_v33 = vld [vmem:[#allocation5 + $0xa48] ss:$48 sps:$4 sm:$0xff]   ;;  %v4292_v37 = vld [vmem:[#allocation5 + $0x9ec] ss:$48 sps:$4 sm:$0xff]  }
 0x166   :  { %v4476_v49 = vadd.f32 %v2538_v45, %v2495_v44  ;;  %v4287_v38 = vld [vmem:[#allocation5 + $0x3e8] ss:$48 sps:$4 sm:$0xff]   ;;  %v4295_v40 = vld [vmem:[#allocation5 + $0x38c] ss:$48 sps:$4 sm:$0xff]  }
 0x167   :  { %2804 = vmatpush1.bf16.msra.mxu0 %v4221_v42  ;;  %v4290_v39 = vld [vmem:[#allocation5 + $0x9e8] ss:$48 sps:$4 sm:$0xff]   ;;  %v4298_v42 = vld [vmem:[#allocation5 + $0x98c] ss:$48 sps:$4 sm:$0xff]  }
 0x168   :  { %2847 = vmatpush1.bf16.msra.mxu1 %v4224_v43  ;;  %2805 = vmatprep.subr.bf16.mxu0 %v4229_v46  ;;  %v4293_v43 = vld [vmem:[#allocation5 + $0x388] ss:$48 sps:$4 sm:$0xff]   ;;  %v4301_v45 = vld [vmem:[#allocation5 + $0x32c] ss:$48 sps:$4 sm:$0xff]  }
 0x169   :  { %2848 = vmatprep.subr.bf16.mxu1 %v4232_v47  ;;  %v4296_v44 = vld [vmem:[#allocation5 + $0x988] ss:$48 sps:$4 sm:$0xff]   ;;  %v4304_v46 = vld [vmem:[#allocation5 + $0x92c] ss:$48 sps:$4 sm:$0xff]  }
 0x16a   :  { %v4299_v47 = vld [vmem:[#allocation5 + $0x328] ss:$48 sps:$4 sm:$0xff]  }
 0x16b   :  { %2806 = vmatpush1.bf16.msra.mxu0 %v4227_v20  ;;  %v4302_v20 = vld [vmem:[#allocation5 + $0x928] ss:$48 sps:$4 sm:$0xff]  }
 0x16c   :  { %2849 = vmatpush1.bf16.msra.mxu1 %v4230_v21  ;;  %2807 = vmatprep.subr.bf16.mxu0 %v4235_v51  ;;  %v2449_v21 = vadd.f32 %v4454_v15, %v4452_v14  ;;  %v2535_v51 = vadd.f32 %v4470_v36, %v4468_v35 }
 0x16d   :  { %2850 = vmatprep.subr.bf16.mxu1 %v4238_v52 }
 0x16e   :  { %v2886_v52 = vpack.c.bf16 %v2449_v21, %v2449_v21 }
 0x16f   :  { %2808 = vmatpush1.bf16.msra.mxu0 %v4233_v53  ;;  %v2888_v53 = vpack.c.bf16 %v2535_v51, %v2535_v51 }
 0x170   :  { %2851 = vmatpush1.bf16.msra.mxu1 %v4236_v54  ;;  %2809 = vmatprep.subr.bf16.mxu0 %v4241_v55 }
 0x171   :  { %2852 = vmatprep.subr.bf16.mxu1 %v4244_v56 }
 0x173   :  { %2810 = vmatpush1.bf16.msra.mxu0 %v4239_v57 }
 0x174   :  { %2853 = vmatpush1.bf16.msra.mxu1 %v4242_v58  ;;  %2811 = vmatprep.subr.bf16.mxu0 %v4247_v59 }
 0x175   :  { %2854 = vmatprep.subr.bf16.mxu1 %v4250_v60 }
 0x177   :  { %2812 = vmatpush1.bf16.msra.mxu0 %v4245_v61 }
 0x178   :  { %2855 = vmatpush1.bf16.msra.mxu1 %v4248_v62  ;;  %2813 = vmatprep.subr.bf16.mxu0 %v4253_v63 }
 0x179   :  { %2856 = vmatprep.subr.bf16.mxu1 %v4256_v0 }
 0x17b   :  { %2814 = vmatpush1.bf16.msra.mxu0 %v4251_v1 }
 0x17c   :  { %2857 = vmatpush1.bf16.msra.mxu1 %v4254_v2  ;;  %2815 = vmatprep.subr.bf16.mxu0 %v4259_v3 }
 0x17d   :  { %2858 = vmatprep.subr.bf16.mxu1 %v4262_v6  ;;  %v2451_v6 = vadd.f32 %v4458_v23, %v4456_v5  ;;  %v2887_v5 = vpack.c.bf16 %v4466_v32, %v4466_v32  ;;  %v2892_v23 = vpack.c.bf16 %v4476_v49, %v4476_v49 }
 0x17f   :  { %2816 = vmatpush2.bf16.msra.mxu0 %v4257_v7  ;;  %v2889_v7 = vpack.c.bf16 %v2451_v6, %v2451_v6 }
 0x180   :  { %2859 = vmatpush2.bf16.msra.mxu1 %v4260_v10  ;;  %2817 = vmatprep.subr.bf16.mxu0 %v4265_v11 }
 0x181   :  { %2860 = vmatprep.subr.bf16.mxu1 %v4268_v12 }
 0x183   :  { %2818 = vmatpush2.bf16.msra.mxu0 %v4263_v13 }
 0x184   :  { %2861 = vmatpush2.bf16.msra.mxu1 %v4266_v16  ;;  %2819 = vmatprep.subr.bf16.mxu0 %v4271_v17 }
 0x185   :  { %2862 = vmatprep.subr.bf16.mxu1 %v4274_v22 }
 0x187   :  { %2820 = vmatpush2.bf16.msra.mxu0 %v4269_v4 }
 0x188   :  { %2863 = vmatpush2.bf16.msra.mxu1 %v4272_v24  ;;  %2821 = vmatprep.subr.bf16.mxu0 %v4277_v25 }
 0x189   :  { %2864 = vmatprep.subr.bf16.mxu1 %v4280_v26 }
 0x18b   :  { %2822 = vmatpush2.bf16.msra.mxu0 %v4275_v48 }
 0x18c   :  { %2865 = vmatpush2.bf16.msra.mxu1 %v4278_v28  ;;  %2823 = vmatprep.subr.bf16.mxu0 %v4283_v29  ;;  %v2891_v28 = vpack.c.bf16 %v4474_v41, %v4474_v41 }
 0x18d   :  { %2866 = vmatprep.subr.bf16.mxu1 %v4286_v30 }
 0x18f   :  { %2824 = vmatpush2.bf16.msra.mxu0 %v4281_v31 }
 0x190   :  { %2867 = vmatpush2.bf16.msra.mxu1 %v4284_v33  ;;  %2825 = vmatprep.subr.bf16.mxu0 %v4289_v34 }
 0x191   :  { %2868 = vmatprep.subr.bf16.mxu1 %v4292_v37 }
 0x193   :  { %2826 = vmatpush2.bf16.msra.mxu0 %v4287_v38 }
 0x194   :  { %2869 = vmatpush2.bf16.msra.mxu1 %v4290_v39  ;;  %2827 = vmatprep.subr.bf16.mxu0 %v4295_v40 }
 0x195   :  { %2870 = vmatprep.subr.bf16.mxu1 %v4298_v42 }
 0x197   :  { %2828 = vmatpush2.bf16.msra.mxu0 %v4293_v43 }
 0x198   :  { %2871 = vmatpush2.bf16.msra.mxu1 %v4296_v44  ;;  %2829 = vmatprep.subr.bf16.mxu0 %v4301_v45 }
 0x199   :  { %2872 = vmatprep.subr.bf16.mxu1 %v4304_v46 }
 0x19b   :  { %2830 = vmatpush2.bf16.msra.mxu0 %v4299_v47 }
 0x19c   :  { %2873 = vmatpush2.bf16.msra.mxu1 %v4302_v20 }
 0x19e   :  { %v2575_v54 = vpop.f32.mrf.mxu0  ;;  %2832 = vmatmul.mubr.bf16.vlgmr.msra.gmra.mxu0 %v4440_v18  ;;  %v2447_v18 = vadd.f32 %v4450_v9, %v4448_v8 }
 0x19f   :  { %v2618_v55 = vpop.f32.mrf.mxu1  ;;  %2875 = vmatmul.mubr.bf16.vlgmr.msra.gmra.mxu1 %v4443_v19  ;;  %2941 = vmatprep.mubr.bf16.mxu0 %v2886_v52  ;;  %v2453_v19 = vadd.f32 %v4462_v27, %v4460_v50 }
 0x1a0   :  { %2981 = vmatprep.mubr.bf16.mxu1 %v2888_v53  ;;  %v2619_v56 = vadd.f32 %v2618_v55, %v2575_v54  ;;  %v2577_v57 = vpop.f32.mrf.mxu0  ;;  %v2885_v1 = vpack.c.bf16 %v2447_v18, %v2447_v18 }
 0x1a1   :  { %v2620_v58 = vpop.f32.mrf.mxu1  ;;  %v2890_v2 = vpack.c.bf16 %v2453_v19, %v2453_v19 }
 0x1a2   :  { %v2621_v59 = vadd.f32 %v2620_v58, %v2577_v57  ;;  %v2579_v14 = vpop.f32.mrf.mxu0  ;;  %v2893_v35 = vpack.c.bf16 %v2619_v56, %v2619_v56 }
 0x1a3   :  { %v2622_v15 = vpop.f32.mrf.mxu1 }
 0x1a4   :  { %v2894_v60 = vpack.c.bf16 %v2621_v59, %v2621_v59  ;;  %v2581_v36 = vpop.f32.mrf.mxu0  ;;  %v2623_v0 = vadd.f32 %v2622_v15, %v2579_v14 }
 0x1a5   :  { %v2624_v61 = vpop.f32.mrf.mxu1 }
 0x1a6   :  { %v2625_v62 = vadd.f32 %v2624_v61, %v2581_v36  ;;  %2923 = vmatprep.subr.bf16.mxu0 %v2894_v60  ;;  %v2897_v3 = vpack.c.bf16 %v2623_v0, %v2623_v0 }
 0x1a7   :  { %2924 = vmatpush1.bf16.xpose.msra.mxu0 %v2893_v35 }
 0x1a8   :  { %v2898_v63 = vpack.c.bf16 %v2625_v62, %v2625_v62 }
 0x1aa   :  { %3003 = vmatprep.subr.bf16.mxu0 %v2898_v63 }
 0x1ae   :  { %2942 = vmatmul.mubr.bf16.vlgmr.msra.gmra.mxu0 %v2885_v1 }
 0x1af   :  { %3004 = vmatpush1.bf16.xpose.msra.mxu0 %v2897_v3  ;;  %3021 = vmatprep.mubr.bf16.mxu0 %v2890_v2 }
 0x1b6   :  { %3022 = vmatmul.mubr.bf16.vlgmr.msra.gmra.mxu0 %v2889_v7 }
 0x1de   :  { %v2661_v10 = vpop.f32.mrf.mxu0 }
 0x1df   :  { %v2704_v11 = vpop.f32.mrf.mxu1 }
 0x1e0   :  { %v2705_v8 = vadd.f32 %v2704_v11, %v2661_v10  ;;  %v2663_v9 = vpop.f32.mrf.mxu0 }
 0x1e1   :  { %v2706_v12 = vpop.f32.mrf.mxu1 }
 0x1e2   :  { %v2707_v13 = vadd.f32 %v2706_v12, %v2663_v9  ;;  %v2665_v50 = vpop.f32.mrf.mxu0  ;;  %v2895_v17 = vpack.c.bf16 %v2705_v8, %v2705_v8 }
 0x1e3   :  { %v2708_v27 = vpop.f32.mrf.mxu1 }
 0x1e4   :  { %v2896_v16 = vpack.c.bf16 %v2707_v13, %v2707_v13  ;;  %v2667_v22 = vpop.f32.mrf.mxu0  ;;  %v2709_v26 = vadd.f32 %v2708_v27, %v2665_v50 }
 0x1e5   :  { %v2710_v4 = vpop.f32.mrf.mxu1 }
 0x1e6   :  { %v2711_v24 = vadd.f32 %v2710_v4, %v2667_v22  ;;  %2963 = vmatprep.subr.bf16.mxu1 %v2896_v16  ;;  %v2899_v48 = vpack.c.bf16 %v2709_v26, %v2709_v26 }
 0x1e7   :  { %2964 = vmatpush1.bf16.xpose.msra.mxu1 %v2895_v17 }
 0x1e8   :  { %v2900_v25 = vpack.c.bf16 %v2711_v24, %v2711_v24 }
 0x1ea   :  { %3043 = vmatprep.subr.bf16.mxu1 %v2900_v25 }
 0x1ee   :  { %2982 = vmatmul.mubr.bf16.vlgmr.msra.gmra.mxu1 %v2887_v5 }
 0x1ef   :  { %3044 = vmatpush1.bf16.xpose.msra.mxu1 %v2899_v48  ;;  %3061 = vmatprep.mubr.bf16.mxu1 %v2892_v23 }
 0x1f6   :  { %3062 = vmatmul.mubr.bf16.vlgmr.msra.gmra.mxu1 %v2891_v28 }
 0x21e   :  { %v2747_v29 = vpop.f32.mrf.mxu0 }
 0x21f   :  { %v2790_v30 = vpop.f32.mrf.mxu1 }
 0x220   :  { %v2791_v31 = vadd.f32 %v2790_v30, %v2747_v29  ;;  %v2749_v33 = vpop.f32.mrf.mxu0  ;;  %v4389_v29 = vmov 0  }
 0x221   :  { %v2792_v34 = vpop.f32.mrf.mxu1  ;;  %3144 = vmatprep.mubr.bf16.mxu0 %v4389_v29  ;;  %3185 = vmatprep.mubr.bf16.mxu1 %v4389_v29 }
 0x222   :  { %v2901_v37 = vpack.c.bf16 %v2791_v31, %v2791_v31  ;;  %v2793_v38 = vadd.f32 %v2792_v34, %v2749_v33  ;;  %v2751_v32 = vpop.f32.mrf.mxu0 }
 0x223   :  { %v2794_v39 = vpop.f32.mrf.mxu1 }
 0x224   :  { %v3101_v49 = vsel %vm3099_vm0, %v2901_v37, 0  ;;  %v2902_v40 = vpack.c.bf16 %v2793_v38, %v2793_v38  ;;  %v4497_v42 = vadd.f32 %v2794_v39, %v2751_v32  ;;  %v2753_v43 = vpop.f32.mrf.mxu0 }
 0x225   :  { %v2796_v44 = vpop.f32.mrf.mxu1 }
 0x226   :  { %v2797_v45 = vadd.f32 %v2796_v44, %v2753_v43  ;;  %3705 = vmatprep.subr.msk.bf16.mxu0 %vm3099_vm0, %v2902_v40  ;;  %v2905_v34 = vpack.c.bf16 %v4497_v42, %v4497_v42 }
 0x227   :  { %3127 = vmatpush1.bf16.msra.mxu0 %v3101_v49 }
 0x228   :  { %v2906_v41 = vpack.c.bf16 %v2797_v45, %v2797_v45  ;;  %v3198_v39 = vsel %vm3099_vm0, %v2905_v34, 0 }
 0x22a   :  { %3709 = vmatprep.subr.msk.bf16.mxu0 %vm3099_vm0, %v2906_v41 }
 0x25e   :  { %v2833_v46 = vpop.f32.mrf.mxu0 }
 0x25f   :  { %v2876_v47 = vpop.f32.mrf.mxu1 }
 0x260   :  { %v2877_v20 = vadd.f32 %v2876_v47, %v2833_v46  ;;  %v2835_v21 = vpop.f32.mrf.mxu0 }
 0x261   :  { %v2878_v51 = vpop.f32.mrf.mxu1 }
 0x262   :  { %v2903_v52 = vpack.c.bf16 %v2877_v20, %v2877_v20  ;;  %v2879_v53 = vadd.f32 %v2878_v51, %v2835_v21  ;;  %v2837_v54 = vpop.f32.mrf.mxu0 }
 0x263   :  { %v2880_v55 = vpop.f32.mrf.mxu1 }
 0x264   :  { %v3107_v56 = vsel %vm3099_vm0, %v2903_v52, 0  ;;  %v2904_v57 = vpack.c.bf16 %v2879_v53, %v2879_v53  ;;  %v2881_v58 = vadd.f32 %v2880_v55, %v2837_v54  ;;  %v2839_v59 = vpop.f32.mrf.mxu0 }
 0x265   :  { %v2882_v14 = vpop.f32.mrf.mxu1 }
 0x266   :  { %v2883_v15 = vadd.f32 %v2882_v14, %v2839_v59  ;;  %3707 = vmatprep.subr.msk.bf16.mxu1 %vm3099_vm0, %v2904_v57  ;;  %v2907_v37 = vpack.c.bf16 %v2881_v58, %v2881_v58 }
 0x267   :  { %3168 = vmatpush1.bf16.msra.mxu1 %v3107_v56 }
 0x268   :  { %v2908_v60 = vpack.c.bf16 %v2883_v15, %v2883_v15  ;;  %v3204_v49 = vsel %vm3099_vm0, %v2907_v37, 0 }
 0x26a   :  { %3711 = vmatprep.subr.msk.bf16.mxu1 %vm3099_vm0, %v2908_v60 }
 0x26e   :  { %v2943_v35 = vpop.f32.mrf.mxu0 }
 0x270   :  { %v2945_v36 = vpop.f32.mrf.mxu0 }
 0x272   :  { %v2946_v61 = vpop.f32.mrf.mxu0 }
 0x274   :  { %v2947_v62 = vpop.f32.mrf.mxu0 }
 0x276   :  { %v3023_v18 = vpop.f32.mrf.mxu0 }
 0x278   :  { %v3025_v63 = vpop.f32.mrf.mxu0 }
 0x27a   :  { %v3026_v19 = vpop.f32.mrf.mxu0 }
 0x27c   :  { %v3027_v0 = vpop.f32.mrf.mxu0 }
 0x2ae   :  { %v2983_v1 = vpop.f32.mrf.mxu1 }
 0x2af   :  { %v2984_v2 = vadd.f32 %v2983_v1, %v2943_v35 }
 0x2b0   :  { %v2985_v3 = vpop.f32.mrf.mxu1 }
 0x2b1   :  { %v3069_v6 = vmul.f32 5.0, %v2984_v2 }
 0x2b2   :  { %v2986_v7 = vpop.f32.mrf.mxu1 }
 0x2b3   :  { %v3072_v10 = vsel %vm3071_vm1, %v3069_v6, -inf }
 0x2b4   :  { %v2987_v11 = vpop.f32.mrf.mxu1  ;;  %3073 = vmax.xlane.f32.xlu0 %v3072_v10 }
 0x2b6   :  { %v3063_v8 = vpop.f32.mrf.mxu1 }
 0x2b7   :  { %v3064_v9 = vadd.f32 %v3063_v8, %v3023_v18 }
 0x2b8   :  { %v3065_v12 = vpop.f32.mrf.mxu1 }
 0x2b9   :  { %v3070_v13 = vmul.f32 5.0, %v3064_v9 }
 0x2ba   :  { %v3066_v50 = vpop.f32.mrf.mxu1 }
 0x2bb   :  { %v3075_v27 = vsel %vm3071_vm1, %v3070_v13, -inf }
 0x2bc   :  { %v3067_v16 = vpop.f32.mrf.mxu1  ;;  %3076 = vmax.xlane.f32.xlu0 %v3075_v27 }
 0x33d   :  { %v3074_v17 = vpop.xlane.xlu0 %3073 }
 0x33e   :  { %v3078_v22 = vsub.f32 %v3069_v6, %v3074_v17 }
 0x340   :  { %v3080_v4 = vmul.f32 1.442695, %v3078_v22 }
 0x342   :  { %4305 = vpow2.f32 %v3080_v4 }
 0x345   :  { %v3077_v24 = vpop.xlane.xlu0 %3076 }
 0x346   :  { %v3079_v25 = vsub.f32 %v3070_v13, %v3077_v24 }
 0x348   :  { %v3082_v26 = vmul.f32 1.442695, %v3079_v25 }
 0x34a   :  { %4307 = vpow2.f32 %v3082_v26 }
 0x34f   :  { %v4306_v5 = vpop.eup %4305 }
 0x350   :  { %v3084_v23 = vsel %vm3071_vm1, %v4306_v5, 0.0 }
 0x351   :  { %3085 = vadd.xlane.f32.xlu1 %v3084_v23 }
 0x357   :  { %v4308_v48 = vpop.eup %4307 }
 0x358   :  { %v3087_v28 = vsel %vm3071_vm1, %v4308_v48, 0.0 }
 0x359   :  { %3088 = vadd.xlane.f32.xlu1 %v3087_v28 }
 0x3da   :  { %v3086_v30 = vpop.xlane.xlu1 %3085 }
 0x3db   :  { %4309 = vrcp.f32 %v3086_v30 }
 0x3e2   :  { %v3089_v31 = vpop.xlane.xlu1 %3088 }
 0x3e3   :  { %4311 = vrcp.f32 %v3089_v31 }
 0x3e8   :  { %v4310_v33 = vpop.eup %4309 }
 0x3e9   :  { %v3092_v38 = vmul.f32 %v4310_v33, %v4306_v5 }
 0x3eb   :  { %v3094_v32 = vpack.c.bf16 %v3092_v38, %v3092_v38 }
 0x3ed   :  { %3706 = vmatmul.mubr.msk.bf16.vlgmr.msra.gmra.mxu0 %vm3071_vm1, %v3094_v32  ;;  %3708 = vmatmul.mubr.msk.bf16.vlgmr.msra.gmra.mxu1 %vm3071_vm1, %v3094_v32 }
 0x3ee   :  { %3224 = vmatpush1.bf16.msra.mxu0 %v3198_v39  ;;  %3265 = vmatpush1.bf16.msra.mxu1 %v3204_v49 }
 0x3ef   :  { %3241 = vmatprep.mubr.bf16.mxu0 %v4389_v29  ;;  %3282 = vmatprep.mubr.bf16.mxu1 %v4389_v29 }
 0x3f0   :  { %v4312_v40 = vpop.eup %4311 }
 0x3f1   :  { %v3093_v43 = vmul.f32 %v4312_v40, %v4308_v48 }
 0x3f3   :  { %v3095_v44 = vpack.c.bf16 %v3093_v43, %v3093_v43 }
 0x3f5   :  { %3710 = vmatmul.mubr.msk.bf16.vlgmr.msra.gmra.mxu0 %vm3071_vm1, %v3095_v44  ;;  %3712 = vmatmul.mubr.msk.bf16.vlgmr.msra.gmra.mxu1 %vm3071_vm1, %v3095_v44 }
 0x4ad   :  { %v3146_v42 = vpop.f32.mrf.mxu0  ;;  %v3187_v45 = vpop.f32.mrf.mxu1 }
 0x4ae   :  { %3291 = vst [vmem:[#allocation7] sm:$0xff] %v3146_v42  ;;  %3293 = vst [vmem:[#allocation7 + $0x10] sm:$0xff] %v3187_v45 }
 0x4af   :  { %v3148_v41 = vpop.f32.mrf.mxu0  ;;  %v3189_v46 = vpop.f32.mrf.mxu1 }
 0x4b0   :  { %3292 = vst [vmem:[#allocation7 + $0x8] sm:$0xff] %v3148_v41  ;;  %3294 = vst [vmem:[#allocation7 + $0x18] sm:$0xff] %v3189_v46 }
 0x4b1   :  { %v3150_v47 = vpop.f32.mrf.mxu0  ;;  %v3191_v20 = vpop.f32.mrf.mxu1 }
 0x4b3   :  { %v3151_v21 = vpop.f32.mrf.mxu0  ;;  %v3192_v51 = vpop.f32.mrf.mxu1 }
 0x4b5   :  { %v3243_v52 = vpop.f32.mrf.mxu0  ;;  %v3284_v53 = vpop.f32.mrf.mxu1 }
 0x4b6   :  { %3295 = vst [vmem:[#allocation7 + $0x20] sm:$0xff] %v3243_v52  ;;  %3297 = vst [vmem:[#allocation7 + $0x30] sm:$0xff] %v3284_v53 }
 0x4b7   :  { %v3245_v54 = vpop.f32.mrf.mxu0  ;;  %v3286_v55 = vpop.f32.mrf.mxu1 }
 0x4b8   :  { %3296 = vst [vmem:[#allocation7 + $0x28] sm:$0xff] %v3245_v54  ;;  %3298 = vst [vmem:[#allocation7 + $0x38] sm:$0xff] %v3286_v55 }
 0x4b9   :  { %v3247_v56 = vpop.f32.mrf.mxu0  ;;  %v3288_v57 = vpop.f32.mrf.mxu1 }
 0x4ba   :  { %4368 = shalt.err (!%p4365_p0)
}
 0x4bb   :  { %s4391_s24 = smov 512   ;;  %s4392_s25 = smov 32   ;;  %v3248_v58 = vpop.f32.mrf.mxu0  ;;  %v3289_v59 = vpop.f32.mrf.mxu1 }
 0x4bc   :  { %3310 = dma.vmem_to_hbm [thread:$0]  %s3305_s1, 1024, %s4521_s2, [#allocation4], %s4391_s24, %s4391_s24, %s4392_s25  }
 0x4bd   :  { %4381 = dma.done.wait [#allocation4], 1024  }
 0x4be   :  { %4382 = vsyncadd [#allocation4], 4294966272 }
 0x4bf   :  { %3314 = vsyncpa [#allocation3], 1 }
 0x4c0   :  { %3315 = vsyncpa [#allocation6], 1 }
 0x4c1   :  { %3316 = vsyncpa [#allocation4], 1 }

</bundles_post_ra>
